<compile_context>
chip_gen: v7x
topology: tpu7x:2x2x1
jax: 0.10.0
libtpu: 0.0.40
codegen_flags: <defaults>
</compile_context>

<pallas_src>
import functools

import numpy as np
import jax
import jax.numpy as jnp
from jax.experimental import pallas as pl
from jax.experimental.pallas import tpu as pltpu

# Python float on purpose: a module-level jnp scalar would be captured as a
# constant by the Pallas kernel tracer and rejected.
_NEG = -1e30


def _encoder_kernel(b_pad,
                    grp_rng_ref,                 # SMEM (num_tiles, 2) int32
                    x_ref, seg_ref,
                    w1_ref, b1_ref, w2_ref, b2_ref,
                    w3g_ref, w3f_ref, b3_ref, w4_ref, b4_ref,
                    v_ref,
                    g_acc, gw3_acc):
    f32 = jnp.float32
    bf16 = jnp.bfloat16
    pass_id = pl.program_id(0)   # 0: per-group maxima of f, 1: finish
    tile_id = pl.program_id(1)   # tile along the point axis
    tile = x_ref.shape[0]

    x = x_ref[...]               # (T, 8)  f32, channel-padded
    seg = seg_ref[...]           # (T, 1)  int32 segment id, -1 for padded rows

    # Shared front-end: conv1+bn1+relu, conv2+bn2.  Recomputed in pass 1
    # (cheap: <5% of total FLOPs) to avoid an f writeback/reload through HBM.
    h1 = jnp.dot(x.astype(bf16), w1_ref[...], preferred_element_type=f32) + b1_ref[...]
    h1 = jnp.maximum(h1, 0.0)
    f = jnp.dot(h1.astype(bf16), w2_ref[...], preferred_element_type=f32) + b2_ref[...]

    # Groups are contiguous along the point axis, so only groups in
    # [first, last] have points inside this tile.
    first = grp_rng_ref[tile_id, 0]
    last = grp_rng_ref[tile_id, 1]

    def seg_col(b):
        # (T, 1) additive mask: 0 for points of group b, -1e30 otherwise
        # (padded rows have seg == -1 and never match).
        return jnp.where(seg == b, 0.0, _NEG).astype(f32)

    @pl.when(jnp.logical_and(pass_id == 0, tile_id == 0))
    def _():
        g_acc[...] = jnp.full((b_pad, 256), _NEG, f32)

    @pl.when(pass_id == 0)
    def _():
        # point_wise_maxpool(f, npts): fold this tile's per-group maxima
        # into the (b_pad, 256) accumulator, only for groups in this tile.
        def body(b, carry):
            tmax = jnp.max(f + seg_col(b), axis=0, keepdims=True)        # (1, 256)
            g_acc[pl.ds(b, 1), :] = jnp.maximum(g_acc[pl.ds(b, 1), :], tmax)
            return carry
        jax.lax.fori_loop(first, last + 1, body, 0)

    @pl.when(pass_id == 1)
    def _():
        @pl.when(tile_id == 0)
        def _():
            v_ref[...] = jnp.full((b_pad, 1024), _NEG, f32)
            # Associativity hoist: (oh @ g_acc) @ w3g == oh @ (g_acc @ w3g).
            gw3_acc[...] = jnp.dot(g_acc[...].astype(bf16), w3g_ref[...],
                                   preferred_element_type=f32)           # (b_pad, 512)

        # One-hot segment membership built in-kernel (no HBM one-hot stream).
        gid = jax.lax.broadcasted_iota(jnp.int32, (tile, b_pad), 1)
        oh = jnp.where(seg == gid, 1.0, 0.0).astype(bf16)                # (T, b_pad)

        # conv3 over cat([expand(g), f]) realised as oh@(g@w3g) + f@w3f.
        h3 = (jnp.dot(oh, gw3_acc[...].astype(bf16), preferred_element_type=f32)
              + jnp.dot(f.astype(bf16), w3f_ref[...], preferred_element_type=f32)
              + b3_ref[...])
        h3 = jnp.maximum(h3, 0.0)
        h4 = jnp.dot(h3.astype(bf16), w4_ref[...],
                     preferred_element_type=f32) + b4_ref[...]           # (T, 1024)

        # Final point_wise_maxpool directly into the VMEM-resident output.
        def body(b, carry):
            tmax = jnp.max(h4 + seg_col(b), axis=0, keepdims=True)       # (1, 1024)
            v_ref[pl.ds(b, 1), :] = jnp.maximum(v_ref[pl.ds(b, 1), :], tmax)
            return carry
        jax.lax.fori_loop(first, last + 1, body, 0)


def _fold_bn(w, b, gamma, beta, mean, var, eps=1e-5):
    """Fold inference-mode BatchNorm1d into a (Cin, Cout) matmul weight/bias."""
    scale = gamma / jnp.sqrt(var + eps)
    return w * scale[None, :], (b - mean) * scale + beta


def init_params(key):
    """Deterministic synthetic parameters (conv weights + BN, folded)."""
    dims = [(3, 128), (128, 256), (512, 512), (512, 1024)]
    params = {}
    for i, (cin, cout) in enumerate(dims, start=1):
        key, kw, kb, kg, kbe, km, kv = jax.random.split(key, 7)
        w = jax.random.normal(kw, (cin, cout), jnp.float32) / np.sqrt(cin)
        b = 0.05 * jax.random.normal(kb, (cout,), jnp.float32)
        gamma = 1.0 + 0.1 * jax.random.normal(kg, (cout,), jnp.float32)
        beta = 0.1 * jax.random.normal(kbe, (cout,), jnp.float32)
        mean = 0.05 * jax.random.normal(km, (cout,), jnp.float32)
        var = 0.5 + jax.random.uniform(kv, (cout,), jnp.float32)
        params[f"w{i}"], params[f"b{i}"] = _fold_bn(w, b, gamma, beta, mean, var)
    return params


def encoder_forward(params, x, npts, *, tile=1024):
    """x: (1, 3, N) float32 (torch NCW layout), npts: python list, sum == N."""
    assert x.shape[0] == 1 and x.shape[1] == 3
    assert tile % 8 == 0
    n_total = x.shape[2]
    assert sum(npts) == n_total
    num_groups = len(npts)
    b_pad = max(8, ((num_groups + 7) // 8) * 8)
    num_tiles = -(-n_total // tile)
    n_pad = num_tiles * tile

    # Points-major layout, channels 3 -> 8, rows padded to a tile multiple.
    xt = jnp.transpose(x[0], (1, 0))                                # (N, 3)
    x_pad = jnp.pad(xt, ((0, n_pad - n_total), (0, 8 - 3)))         # (n_pad, 8)

    # Segment ids per point; padded rows get -1 (match no group).
    seg_np = np.repeat(np.arange(num_groups, dtype=np.int32), npts)
    seg_pad = np.full((n_pad, 1), -1, np.int32)
    seg_pad[:n_total, 0] = seg_np
    seg_ids = jnp.asarray(seg_pad)

    # Per-tile [first_group, last_group] (inclusive) — scalar prefetched.
    grp_rng_np = np.zeros((num_tiles, 2), np.int32)
    for t in range(num_tiles):
        lo, hi = t * tile, min((t + 1) * tile, n_total)
        if hi > lo:
            grp_rng_np[t, 0] = seg_np[lo]
            grp_rng_np[t, 1] = seg_np[hi - 1]
        else:                       # fully padded tile: empty group range
            grp_rng_np[t, 0], grp_rng_np[t, 1] = 1, 0
    grp_rng = jnp.asarray(grp_rng_np)

    bf16 = jnp.bfloat16
    w1 = jnp.pad(params["w1"], ((0, 8 - 3), (0, 0))).astype(bf16)   # (8, 128)
    w2 = params["w2"].astype(bf16)                                  # (128, 256)
    w3g = params["w3"][:256, :].astype(bf16)                        # (256, 512)
    w3f = params["w3"][256:, :].astype(bf16)                        # (256, 512)
    w4 = params["w4"].astype(bf16)                                  # (512, 1024)
    b1 = params["b1"].reshape(1, -1)
    b2 = params["b2"].reshape(1, -1)
    b3 = params["b3"].reshape(1, -1)
    b4 = params["b4"].reshape(1, -1)

    tiled = lambda p, i, rng: (i, 0)     # tiled along the point axis
    const = lambda p, i, rng: (0, 0)     # weights / output resident

    in_specs = [
        pl.BlockSpec((tile, 8), tiled),
        pl.BlockSpec((tile, 1), tiled),
        pl.BlockSpec((8, 128), const),
        pl.BlockSpec((1, 128), const),
        pl.BlockSpec((128, 256), const),
        pl.BlockSpec((1, 256), const),
        pl.BlockSpec((256, 512), const),
        pl.BlockSpec((256, 512), const),
        pl.BlockSpec((1, 512), const),
        pl.BlockSpec((512, 1024), const),
        pl.BlockSpec((1, 1024), const),
    ]

    flops_per_pt = (2 * 2 * (8 * 128 + 128 * 256)   # conv1/conv2, both passes
                    + 2 * b_pad * 512               # one-hot expand matmul
                    + 2 * 256 * 512                 # conv3 (f part)
                    + 2 * 512 * 1024)               # conv4
    flops = int(n_pad * flops_per_pt + 2 * b_pad * 256 * 512)
    bytes_accessed = int(2 * x_pad.size * 4 + 2 * seg_ids.size * 4
                         + (w1.size + w2.size + w3g.size + w3f.size + w4.size) * 2
                         + (b1.size + b2.size + b3.size + b4.size) * 4
                         + b_pad * 1024 * 4)

    kernel = functools.partial(_encoder_kernel, b_pad)
    v = pl.pallas_call(
        kernel,
        out_shape=jax.ShapeDtypeStruct((b_pad, 1024), jnp.float32),
        grid_spec=pltpu.PrefetchScalarGridSpec(
            num_scalar_prefetch=1,
            grid=(2, num_tiles),
            in_specs=in_specs,
            out_specs=pl.BlockSpec((b_pad, 1024), const),
            scratch_shapes=[pltpu.VMEM((b_pad, 256), jnp.float32),
                            pltpu.VMEM((b_pad, 512), jnp.float32)]),
        compiler_params=pltpu.CompilerParams(
            dimension_semantics=("arbitrary", "arbitrary"),
            vmem_limit_bytes=48 * 1024 * 1024),
        cost_estimate=pl.CostEstimate(
            flops=flops, transcendentals=0, bytes_accessed=bytes_accessed),
    )(grp_rng, x_pad, seg_ids, w1, b1, w2, b2, w3g, w3f, b3, w4, b4)
    return v[:num_groups]


def _rt_bf16(a):
    """bf16 round-trip (matches the kernel's bf16 matmul-operand rounding)."""
    return np.asarray(
        jnp.asarray(np.asarray(a, np.float32)).astype(jnp.bfloat16).astype(jnp.float32))


def encoder_reference(params, x, npts):
    """NumPy reference mirroring the torch forward (folded BN), with the same
    bf16 rounding points as the kernel (including the hoisted g @ w3g)."""
    w = {k: _rt_bf16(v) for k, v in params.items() if k.startswith("w")}
    b = {k: np.asarray(v, np.float32) for k, v in params.items() if k.startswith("b")}
    xt = _rt_bf16(np.asarray(x)[0].T)                               # (N, 3)
    h1 = np.maximum(xt @ w["w1"] + b["b1"], 0.0)
    f = _rt_bf16(h1) @ w["w2"] + b["b2"]                            # (N, 256)
    offs = np.cumsum([0] + list(npts))
    nb = len(npts)
    g = np.stack([f[offs[i]:offs[i + 1]].max(axis=0) for i in range(nb)], 0)
    # Kernel computes gw3 = bf16(g) @ bf16(w3g) in f32, stores it, and the
    # one-hot matmul exactly selects bf16(gw3) rows per point.
    gw3 = _rt_bf16(_rt_bf16(g) @ w["w3"][:256, :])                  # (nb, 512)
    gs3 = np.concatenate(
        [np.broadcast_to(gw3[i], (npts[i], gw3.shape[1])) for i in range(nb)], 0)
    h3 = np.maximum(gs3 + _rt_bf16(f) @ w["w3"][256:, :] + b["b3"], 0.0)
    h4 = _rt_bf16(h3) @ w["w4"] + b["b4"]
    return np.stack([h4[offs[i]:offs[i + 1]].max(axis=0) for i in range(nb)], 0)


if __name__ == "__main__":
    key = jax.random.PRNGKey(0)
    pkey, xkey = jax.random.split(key)
    params = init_params(pkey)

    npts = [10, 6]                      # two concatenated point clouds
    n_total = sum(npts)                 # N = 16
    x = jax.random.normal(xkey, (1, 3, n_total), jnp.float32)

    np_params = {k: np.asarray(val) for k, val in params.items()}
    v_ref = encoder_reference(np_params, np.asarray(x), npts)

    # Small tile exercises the multi-tile / cross-tile max path (group 0
    # spans both tiles), then the default production tile size.
    v_small = jax.block_until_ready(encoder_forward(params, x, npts, tile=8))
    np.testing.assert_allclose(np.asarray(v_small), v_ref, rtol=3e-3, atol=3e-3)

    v_big = jax.block_until_ready(encoder_forward(params, x, npts, tile=1024))
    np.testing.assert_allclose(np.asarray(v_big), v_ref, rtol=3e-3, atol=3e-3)

    print("KERNEL_OK")
</pallas_src>

<mosaic_0001>
module attributes {stable_mosaic.version = 11 : i64} {
  func.func @_encoder_kernel(%arg0: i32, %arg1: i32, %arg2: memref<2x2xi32, #tpu.memory_space<smem>>, %arg3: memref<8x8xf32, #tpu.memory_space<vmem>>, %arg4: memref<8x1xi32, #tpu.memory_space<vmem>>, %arg5: memref<8x128xbf16, #tpu.memory_space<vmem>>, %arg6: memref<1x128xf32, #tpu.memory_space<vmem>>, %arg7: memref<128x256xbf16, #tpu.memory_space<vmem>>, %arg8: memref<1x256xf32, #tpu.memory_space<vmem>>, %arg9: memref<256x512xbf16, #tpu.memory_space<vmem>>, %arg10: memref<256x512xbf16, #tpu.memory_space<vmem>>, %arg11: memref<1x512xf32, #tpu.memory_space<vmem>>, %arg12: memref<512x1024xbf16, #tpu.memory_space<vmem>>, %arg13: memref<1x1024xf32, #tpu.memory_space<vmem>>, %arg14: memref<8x1024xf32, #tpu.memory_space<vmem>>, %arg15: memref<8x256xf32, #tpu.memory_space<vmem>>, %arg16: memref<8x512xf32, #tpu.memory_space<vmem>>) attributes {dimension_semantics = [#tpu.dimension_semantics<arbitrary>, #tpu.dimension_semantics<arbitrary>], iteration_bounds = array<i64: 2, 2>, scalar_prefetch = 1 : i64, scratch_operands = 2 : i64, tpu.core_type = #tpu.core_type<tc>, window_params = [{transform_indices = @transform_0, window_bounds = array<i64: 8, 8>}, {transform_indices = @transform_1, window_bounds = array<i64: 8, 1>}, {pipeline_mode = #tpu.pipeline_mode<synchronous>, transform_indices = @transform_2, window_bounds = array<i64: 8, 128>}, {pipeline_mode = #tpu.pipeline_mode<synchronous>, transform_indices = @transform_3, window_bounds = array<i64: 1, 128>}, {pipeline_mode = #tpu.pipeline_mode<synchronous>, transform_indices = @transform_4, window_bounds = array<i64: 128, 256>}, {pipeline_mode = #tpu.pipeline_mode<synchronous>, transform_indices = @transform_5, window_bounds = array<i64: 1, 256>}, {pipeline_mode = #tpu.pipeline_mode<synchronous>, transform_indices = @transform_6, window_bounds = array<i64: 256, 512>}, {pipeline_mode = #tpu.pipeline_mode<synchronous>, transform_indices = @transform_7, window_bounds = array<i64: 256, 512>}, {pipeline_mode = #tpu.pipeline_mode<synchronous>, transform_indices = @transform_8, window_bounds = array<i64: 1, 512>}, {pipeline_mode = #tpu.pipeline_mode<synchronous>, transform_indices = @transform_9, window_bounds = array<i64: 512, 1024>}, {pipeline_mode = #tpu.pipeline_mode<synchronous>, transform_indices = @transform_10, window_bounds = array<i64: 1, 1024>}, {pipeline_mode = #tpu.pipeline_mode<synchronous>, transform_indices = @transform_11, window_bounds = array<i64: 8, 1024>}]} {
    %c0 = arith.constant 0 : index
    %c0_0 = arith.constant 0 : index
    %0 = vector.load %arg3[%c0, %c0_0] : memref<8x8xf32, #tpu.memory_space<vmem>>, vector<8x8xf32>
    %c0_1 = arith.constant 0 : index
    %c0_2 = arith.constant 0 : index
    %1 = vector.load %arg4[%c0_1, %c0_2] : memref<8x1xi32, #tpu.memory_space<vmem>>, vector<8x1xi32>
    %2 = arith.truncf %0 : vector<8x8xf32> to vector<8x8xbf16>
    %c0_3 = arith.constant 0 : index
    %c0_4 = arith.constant 0 : index
    %3 = vector.load %arg5[%c0_3, %c0_4] : memref<8x128xbf16, #tpu.memory_space<vmem>>, vector<8x128xbf16>
    %cst = arith.constant dense<0.000000e+00> : vector<8x128xf32>
    %4 = tpu.matmul %2, %3, %cst {dimension_numbers = #tpu.dot_dimension_numbers<[1], [0], [0], [1], [0, 0, 1, 1], [], []>} : vector<8x8xbf16>, vector<8x128xbf16>, vector<8x128xf32> -> vector<8x128xf32>
    %c0_5 = arith.constant 0 : index
    %c0_6 = arith.constant 0 : index
    %5 = vector.load %arg6[%c0_5, %c0_6] : memref<1x128xf32, #tpu.memory_space<vmem>>, vector<1x128xf32>
    %6 = vector.broadcast %5 : vector<1x128xf32> to vector<8x128xf32>
    %7 = arith.addf %4, %6 : vector<8x128xf32>
    %cst_7 = arith.constant 0.000000e+00 : f32
    %8 = vector.broadcast %cst_7 : f32 to vector<8x128xf32>
    %9 = arith.maximumf %7, %8 : vector<8x128xf32>
    %10 = arith.truncf %9 : vector<8x128xf32> to vector<8x128xbf16>
    %c0_8 = arith.constant 0 : index
    %c0_9 = arith.constant 0 : index
    %11 = vector.load %arg7[%c0_8, %c0_9] : memref<128x256xbf16, #tpu.memory_space<vmem>>, vector<128x256xbf16>
    %cst_10 = arith.constant dense<0.000000e+00> : vector<8x256xf32>
    %12 = tpu.matmul %10, %11, %cst_10 {dimension_numbers = #tpu.dot_dimension_numbers<[1], [0], [0], [1], [0, 0, 1, 1], [], []>} : vector<8x128xbf16>, vector<128x256xbf16>, vector<8x256xf32> -> vector<8x256xf32>
    %c0_11 = arith.constant 0 : index
    %c0_12 = arith.constant 0 : index
    %13 = vector.load %arg8[%c0_11, %c0_12] : memref<1x256xf32, #tpu.memory_space<vmem>>, vector<1x256xf32>
    %14 = vector.broadcast %13 : vector<1x256xf32> to vector<8x256xf32>
    %15 = arith.addf %12, %14 : vector<8x256xf32>
    %16 = arith.index_cast %arg1 : i32 to index
    %c0_13 = arith.constant 0 : index
    %17 = memref.load %arg2[%16, %c0_13] : memref<2x2xi32, #tpu.memory_space<smem>>
    %18 = arith.index_cast %arg1 : i32 to index
    %c1 = arith.constant 1 : index
    %19 = memref.load %arg2[%18, %c1] : memref<2x2xi32, #tpu.memory_space<smem>>
    %c0_i32 = arith.constant 0 : i32
    %20 = arith.cmpi eq, %arg0, %c0_i32 : i32
    %c0_i32_14 = arith.constant 0 : i32
    %21 = arith.cmpi eq, %arg1, %c0_i32_14 : i32
    %22 = arith.andi %20, %21 : i1
    %23 = arith.extui %22 : i1 to i32
    %c0_i32_15 = arith.constant 0 : i32
    %24 = arith.cmpi ne, %23, %c0_i32_15 : i32
    scf.if %24 {
      %cst_19 = arith.constant -1.000000e+30 : f32
      %31 = vector.broadcast %cst_19 : f32 to vector<8x256xf32>
      %c0_20 = arith.constant 0 : index
      %c0_21 = arith.constant 0 : index
      %32 = vector.load %arg15[%c0_20, %c0_21] : memref<8x256xf32, #tpu.memory_space<vmem>>, vector<8x256xf32>
      tpu.vector_store %arg15[%c0_20, %c0_21], %31 {strides = array<i32>} : memref<8x256xf32, #tpu.memory_space<vmem>>, vector<8x256xf32>,
    } else {
    }
    %c0_i32_16 = arith.constant 0 : i32
    %25 = arith.cmpi eq, %arg0, %c0_i32_16 : i32
    %26 = arith.extui %25 : i1 to i32
    %c0_i32_17 = arith.constant 0 : i32
    %27 = arith.cmpi ne, %26, %c0_i32_17 : i32
    scf.if %27 {
      %c1_i32_19 = arith.constant 1 : i32
      %31 = arith.addi %19, %c1_i32_19 : i32
      %c0_i32_20 = arith.constant 0 : i32
      %32 = arith.subi %31, %17 : i32
      %33 = arith.addi %17, %32 : i32
      %c1_i32_21 = arith.constant 1 : i32
      scf.for %arg17 = %17 to %33 step %c1_i32_21  : i32 {
        %34 = vector.broadcast %arg17 : i32 to vector<8x1xi32>
        %35 = arith.cmpi eq, %1, %34 : vector<8x1xi32>
        %cst_22 = arith.constant 0.000000e+00 : f32
        %cst_23 = arith.constant -1.000000e+30 : f32
        %36 = vector.broadcast %cst_22 : f32 to vector<8x1xf32>
        %37 = vector.broadcast %cst_23 : f32 to vector<8x1xf32>
        %38 = arith.select %35, %36, %37 : vector<8x1xi1>, vector<8x1xf32>
        %39 = vector.broadcast %38 : vector<8x1xf32> to vector<8x256xf32>
        %40 = arith.addf %15, %39 : vector<8x256xf32>
        %cst_24 = arith.constant dense<0xFF800000> : vector<256xf32>
        %41 = vector.multi_reduction <maximumf>, %40, %cst_24 [0] : vector<8x256xf32> to vector<256xf32>
        %42 = vector.shape_cast %41 : vector<256xf32> to vector<1x256xf32>
        %43 = arith.index_cast %arg17 : i32 to index
        %c0_25 = arith.constant 0 : index
        %44 = vector.load %arg15[%43, %c0_25] : memref<8x256xf32, #tpu.memory_space<vmem>>, vector<1x256xf32>
        %45 = arith.maximumf %44, %42 : vector<1x256xf32>
        %46 = arith.index_cast %arg17 : i32 to index
        %c0_26 = arith.constant 0 : index
        %47 = vector.load %arg15[%46, %c0_26] : memref<8x256xf32, #tpu.memory_space<vmem>>, vector<1x256xf32>
        tpu.vector_store %arg15[%46, %c0_26], %45 {strides = array<i32>} : memref<8x256xf32, #tpu.memory_space<vmem>>, vector<1x256xf32>,
      }
    } else {
    }
    %c1_i32 = arith.constant 1 : i32
    %28 = arith.cmpi eq, %arg0, %c1_i32 : i32
    %29 = arith.extui %28 : i1 to i32
    %c0_i32_18 = arith.constant 0 : i32
    %30 = arith.cmpi ne, %29, %c0_i32_18 : i32
    scf.if %30 {
      %c0_i32_19 = arith.constant 0 : i32
      %31 = arith.cmpi eq, %arg1, %c0_i32_19 : i32
      %32 = arith.extui %31 : i1 to i32
      %c0_i32_20 = arith.constant 0 : i32
      %33 = arith.cmpi ne, %32, %c0_i32_20 : i32
      scf.if %33 {
        %cst_40 = arith.constant -1.000000e+30 : f32
        %62 = vector.broadcast %cst_40 : f32 to vector<8x1024xf32>
        %c0_41 = arith.constant 0 : index
        %c0_42 = arith.constant 0 : index
        %63 = vector.load %arg14[%c0_41, %c0_42] : memref<8x1024xf32, #tpu.memory_space<vmem>>, vector<8x1024xf32>
        tpu.vector_store %arg14[%c0_41, %c0_42], %62 {strides = array<i32>} : memref<8x1024xf32, #tpu.memory_space<vmem>>, vector<8x1024xf32>,
        %c0_43 = arith.constant 0 : index
        %c0_44 = arith.constant 0 : index
        %64 = vector.load %arg15[%c0_43, %c0_44] : memref<8x256xf32, #tpu.memory_space<vmem>>, vector<8x256xf32>
        %65 = arith.truncf %64 : vector<8x256xf32> to vector<8x256xbf16>
        %c0_45 = arith.constant 0 : index
        %c0_46 = arith.constant 0 : index
        %66 = vector.load %arg9[%c0_45, %c0_46] : memref<256x512xbf16, #tpu.memory_space<vmem>>, vector<256x512xbf16>
        %cst_47 = arith.constant dense<0.000000e+00> : vector<8x512xf32>
        %67 = tpu.matmul %65, %66, %cst_47 {dimension_numbers = #tpu.dot_dimension_numbers<[1], [0], [0], [1], [0, 0, 1, 1], [], []>} : vector<8x256xbf16>, vector<256x512xbf16>, vector<8x512xf32> -> vector<8x512xf32>
        %c0_48 = arith.constant 0 : index
        %c0_49 = arith.constant 0 : index
        %68 = vector.load %arg16[%c0_48, %c0_49] : memref<8x512xf32, #tpu.memory_space<vmem>>, vector<8x512xf32>
        tpu.vector_store %arg16[%c0_48, %c0_49], %67 {strides = array<i32>} : memref<8x512xf32, #tpu.memory_space<vmem>>, vector<8x512xf32>,
      } else {
      }
      %34 = tpu.iota {dimensions = array<i32: 1>} : vector<8x8xi32>
      %35 = vector.broadcast %1 : vector<8x1xi32> to vector<8x8xi32>
      %36 = arith.cmpi eq, %35, %34 : vector<8x8xi32>
      %cst_21 = arith.constant 1.000000e+00 : f32
      %cst_22 = arith.constant 0.000000e+00 : f32
      %37 = vector.broadcast %cst_21 : f32 to vector<8x8xf32>
      %38 = vector.broadcast %cst_22 : f32 to vector<8x8xf32>
      %39 = arith.select %36, %37, %38 : vector<8x8xi1>, vector<8x8xf32>
      %40 = arith.truncf %39 : vector<8x8xf32> to vector<8x8xbf16>
      %c0_23 = arith.constant 0 : index
      %c0_24 = arith.constant 0 : index
      %41 = vector.load %arg16[%c0_23, %c0_24] : memref<8x512xf32, #tpu.memory_space<vmem>>, vector<8x512xf32>
      %42 = arith.truncf %41 : vector<8x512xf32> to vector<8x512xbf16>
      %cst_25 = arith.constant dense<0.000000e+00> : vector<8x512xf32>
      %43 = tpu.matmul %40, %42, %cst_25 {dimension_numbers = #tpu.dot_dimension_numbers<[1], [0], [0], [1], [0, 0, 1, 1], [], []>} : vector<8x8xbf16>, vector<8x512xbf16>, vector<8x512xf32> -> vector<8x512xf32>
      %44 = arith.truncf %15 : vector<8x256xf32> to vector<8x256xbf16>
      %c0_26 = arith.constant 0 : index
      %c0_27 = arith.constant 0 : index
      %45 = vector.load %arg10[%c0_26, %c0_27] : memref<256x512xbf16, #tpu.memory_space<vmem>>, vector<256x512xbf16>
      %cst_28 = arith.constant dense<0.000000e+00> : vector<8x512xf32>
      %46 = tpu.matmul %44, %45, %cst_28 {dimension_numbers = #tpu.dot_dimension_numbers<[1], [0], [0], [1], [0, 0, 1, 1], [], []>} : vector<8x256xbf16>, vector<256x512xbf16>, vector<8x512xf32> -> vector<8x512xf32>
      %47 = arith.addf %43, %46 : vector<8x512xf32>
      %c0_29 = arith.constant 0 : index
      %c0_30 = arith.constant 0 : index
      %48 = vector.load %arg11[%c0_29, %c0_30] : memref<1x512xf32, #tpu.memory_space<vmem>>, vector<1x512xf32>
      %49 = vector.broadcast %48 : vector<1x512xf32> to vector<8x512xf32>
      %50 = arith.addf %47, %49 : vector<8x512xf32>
      %cst_31 = arith.constant 0.000000e+00 : f32
      %51 = vector.broadcast %cst_31 : f32 to vector<8x512xf32>
      %52 = arith.maximumf %50, %51 : vector<8x512xf32>
      %53 = arith.truncf %52 : vector<8x512xf32> to vector<8x512xbf16>
      %c0_32 = arith.constant 0 : index
      %c0_33 = arith.constant 0 : index
      %54 = vector.load %arg12[%c0_32, %c0_33] : memref<512x1024xbf16, #tpu.memory_space<vmem>>, vector<512x1024xbf16>
      %cst_34 = arith.constant dense<0.000000e+00> : vector<8x1024xf32>
      %55 = tpu.matmul %53, %54, %cst_34 {dimension_numbers = #tpu.dot_dimension_numbers<[1], [0], [0], [1], [0, 0, 1, 1], [], []>} : vector<8x512xbf16>, vector<512x1024xbf16>, vector<8x1024xf32> -> vector<8x1024xf32>
      %c0_35 = arith.constant 0 : index
      %c0_36 = arith.constant 0 : index
      %56 = vector.load %arg13[%c0_35, %c0_36] : memref<1x1024xf32, #tpu.memory_space<vmem>>, vector<1x1024xf32>
      %57 = vector.broadcast %56 : vector<1x1024xf32> to vector<8x1024xf32>
      %58 = arith.addf %55, %57 : vector<8x1024xf32>
      %c1_i32_37 = arith.constant 1 : i32
      %59 = arith.addi %19, %c1_i32_37 : i32
      %c0_i32_38 = arith.constant 0 : i32
      %60 = arith.subi %59, %17 : i32
      %61 = arith.addi %17, %60 : i32
      %c1_i32_39 = arith.constant 1 : i32
      scf.for %arg17 = %17 to %61 step %c1_i32_39  : i32 {
        %62 = vector.broadcast %arg17 : i32 to vector<8x1xi32>
        %63 = arith.cmpi eq, %1, %62 : vector<8x1xi32>
        %cst_40 = arith.constant 0.000000e+00 : f32
        %cst_41 = arith.constant -1.000000e+30 : f32
        %64 = vector.broadcast %cst_40 : f32 to vector<8x1xf32>
        %65 = vector.broadcast %cst_41 : f32 to vector<8x1xf32>
        %66 = arith.select %63, %64, %65 : vector<8x1xi1>, vector<8x1xf32>
        %67 = vector.broadcast %66 : vector<8x1xf32> to vector<8x1024xf32>
        %68 = arith.addf %58, %67 : vector<8x1024xf32>
        %cst_42 = arith.constant dense<0xFF800000> : vector<1024xf32>
        %69 = vector.multi_reduction <maximumf>, %68, %cst_42 [0] : vector<8x1024xf32> to vector<1024xf32>
        %70 = vector.shape_cast %69 : vector<1024xf32> to vector<1x1024xf32>
        %71 = arith.index_cast %arg17 : i32 to index
        %c0_43 = arith.constant 0 : index
        %72 = vector.load %arg14[%71, %c0_43] : memref<8x1024xf32, #tpu.memory_space<vmem>>, vector<1x1024xf32>
        %73 = arith.maximumf %72, %70 : vector<1x1024xf32>
        %74 = arith.index_cast %arg17 : i32 to index
        %c0_44 = arith.constant 0 : index
        %75 = vector.load %arg14[%74, %c0_44] : memref<8x1024xf32, #tpu.memory_space<vmem>>, vector<1x1024xf32>
        tpu.vector_store %arg14[%74, %c0_44], %73 {strides = array<i32>} : memref<8x1024xf32, #tpu.memory_space<vmem>>, vector<1x1024xf32>,
      }
    } else {
    }
    return
  }
  func.func @transform_0(%arg0: i32, %arg1: i32, %arg2: memref<2x2xi32, #tpu.memory_space<smem>>) -> (i32, i32) {
    %c0_i32 = arith.constant 0 : i32
    %c0_i32_0 = arith.constant 0 : i32
    return %arg1, %c0_i32 : i32, i32
  }
  func.func @transform_1(%arg0: i32, %arg1: i32, %arg2: memref<2x2xi32, #tpu.memory_space<smem>>) -> (i32, i32) {
    %c0_i32 = arith.constant 0 : i32
    %c0_i32_0 = arith.constant 0 : i32
    return %arg1, %c0_i32 : i32, i32
  }
  func.func @transform_2(%arg0: i32, %arg1: i32, %arg2: memref<2x2xi32, #tpu.memory_space<smem>>) -> (i32, i32) {
    %c0_i32 = arith.constant 0 : i32
    %c0_i32_0 = arith.constant 0 : i32
    %c0_i32_1 = arith.constant 0 : i32
    return %c0_i32, %c0_i32_0 : i32, i32
  }
  func.func @transform_3(%arg0: i32, %arg1: i32, %arg2: memref<2x2xi32, #tpu.memory_space<smem>>) -> (i32, i32) {
    %c0_i32 = arith.constant 0 : i32
    %c0_i32_0 = arith.constant 0 : i32
    %c0_i32_1 = arith.constant 0 : i32
    return %c0_i32, %c0_i32_0 : i32, i32
  }
  func.func @transform_4(%arg0: i32, %arg1: i32, %arg2: memref<2x2xi32, #tpu.memory_space<smem>>) -> (i32, i32) {
    %c0_i32 = arith.constant 0 : i32
    %c0_i32_0 = arith.constant 0 : i32
    %c0_i32_1 = arith.constant 0 : i32
    return %c0_i32, %c0_i32_0 : i32, i32
  }
  func.func @transform_5(%arg0: i32, %arg1: i32, %arg2: memref<2x2xi32, #tpu.memory_space<smem>>) -> (i32, i32) {
    %c0_i32 = arith.constant 0 : i32
    %c0_i32_0 = arith.constant 0 : i32
    %c0_i32_1 = arith.constant 0 : i32
    return %c0_i32, %c0_i32_0 : i32, i32
  }
  func.func @transform_6(%arg0: i32, %arg1: i32, %arg2: memref<2x2xi32, #tpu.memory_space<smem>>) -> (i32, i32) {
    %c0_i32 = arith.constant 0 : i32
    %c0_i32_0 = arith.constant 0 : i32
    %c0_i32_1 = arith.constant 0 : i32
    return %c0_i32, %c0_i32_0 : i32, i32
  }
  func.func @transform_7(%arg0: i32, %arg1: i32, %arg2: memref<2x2xi32, #tpu.memory_space<smem>>) -> (i32, i32) {
    %c0_i32 = arith.constant 0 : i32
    %c0_i32_0 = arith.constant 0 : i32
    %c0_i32_1 = arith.constant 0 : i32
    return %c0_i32, %c0_i32_0 : i32, i32
  }
  func.func @transform_8(%arg0: i32, %arg1: i32, %arg2: memref<2x2xi32, #tpu.memory_space<smem>>) -> (i32, i32) {
    %c0_i32 = arith.constant 0 : i32
    %c0_i32_0 = arith.constant 0 : i32
    %c0_i32_1 = arith.constant 0 : i32
    return %c0_i32, %c0_i32_0 : i32, i32
  }
  func.func @transform_9(%arg0: i32, %arg1: i32, %arg2: memref<2x2xi32, #tpu.memory_space<smem>>) -> (i32, i32) {
    %c0_i32 = arith.constant 0 : i32
    %c0_i32_0 = arith.constant 0 : i32
    %c0_i32_1 = arith.constant 0 : i32
    return %c0_i32, %c0_i32_0 : i32, i32
  }
  func.func @transform_10(%arg0: i32, %arg1: i32, %arg2: memref<2x2xi32, #tpu.memory_space<smem>>) -> (i32, i32) {
    %c0_i32 = arith.constant 0 : i32
    %c0_i32_0 = arith.constant 0 : i32
    %c0_i32_1 = arith.constant 0 : i32
    return %c0_i32, %c0_i32_0 : i32, i32
  }
  func.func @transform_11(%arg0: i32, %arg1: i32, %arg2: memref<2x2xi32, #tpu.memory_space<smem>>) -> (i32, i32) {
    %c0_i32 = arith.constant 0 : i32
    %c0_i32_0 = arith.constant 0 : i32
    %c0_i32_1 = arith.constant 0 : i32
    return %c0_i32, %c0_i32_0 : i32, i32
  }
}

</mosaic_0001>

<bundles_post_ra>
// kernel: tpu_custom_call.1
= control target key start
LH: loop header
LB: loop body
LE: loop exit
PB: predicated region body
PF: predicated region fallthrough
CT: control target
= control target key end

     0   :  { %s5555_s0 = inlined_call_operand.vmem [shape: s32[2,2], index: 0, kind: input, shape index: {}]   ;;  %s5556_s1 = inlined_call_operand.vmem [shape: f32[16,8], index: 1, kind: input, shape index: {}]   ;;  %s5557_s2 = inlined_call_operand.vmem [shape: s32[16,1], index: 2, kind: input, shape index: {}]   ;;  %s5558_s3 = inlined_call_operand.vmem [shape: bf16[8,128], index: 3, kind: input, shape index: {}]   ;;  %s5559_s4 = inlined_call_operand.vmem [shape: f32[1,128], index: 4, kind: input, shape index: {}]   ;;  %s5560_s5 = inlined_call_operand.hbm [shape: bf16[128,256], index: 5, kind: input, shape index: {}]   ;;  %s5561_s6 = inlined_call_operand.vmem [shape: f32[1,256], index: 6, kind: input, shape index: {}]   ;;  %s5562_s7 = inlined_call_operand.hbm [shape: bf16[256,512], index: 7, kind: input, shape index: {}]   ;;  %s5563_s8 = inlined_call_operand.hbm [shape: bf16[256,512], index: 8, kind: input, shape index: {}]   ;;  %s5564_s9 = inlined_call_operand.vmem [shape: f32[1,512], index: 9, kind: input, shape index: {}]   ;;  %s5565_s10 = inlined_call_operand.hbm [shape: bf16[512,1024], index: 10, kind: input, shape index: {}]   ;;  %s5566_s11 = inlined_call_operand.vmem [shape: f32[1,1024], index: 11, kind: input, shape index: {}]   ;;  %s5567_s12 = inlined_call_operand.hbm [shape: f32[8,1024], index: 12, kind: output, shape index: {}]  }
   0x1   :  { %5576 = sst [smem:[#allocation22_spill]] %s5562_s7  ;;  %s17_s23 = sshll.u32 %s5555_s0, 4  ;;  %s18_s23 = int_to_ptr.vmem [resolvable:$true] %s17_s23 }
   0x2   :  { %5577 = sst [smem:[#allocation23_spill]] %s5564_s9  ;;  %s4819_s24 = scalar_lea.vmem %s18_s23, 32 }
   0x3   :  { %5578 = sst [smem:[#allocation24_spill]] %s5566_s11  ;;  %p4820_p0 = scmp.ne.s32.totalorder %s18_s23, %s4819_s24 }
   0x4   :  { %5579 = sst [smem:[#allocation25_spill]] %s5567_s12  ;;  %p4824_p1 = scmp.lt.s32.totalorder %s18_s23, %s18_s23 }
   0x5   :  { %p4825_p2 = scmp.lt.s32.totalorder %s4819_s24, %s4819_s24 }
   0x7   :  { %p4826_p3 = por %p4825_p2, %p4824_p1 }
   0x9   :  { %p4827_p4 = pnand %p4826_p3, %p4820_p0 }
   0xb   :  { %4830 = shalt.err (!%p4827_p4)  }
   0xc   :  { %s5043_s25 = smov [#allocation5]  }
   0xd   :  { %20 = dma.vmem_to_smem %s18_s23, 32, %s5043_s25, [#allocation4] }
   0xe   :  { %4997 = dma.done.wait [#allocation4], 32 }
   0xf   :  { %4998 = vsyncadd [#allocation4], 4294967264 }
  0x10   :  { %22 = sfence }
  0x11   :  { %23 = vsyncpa [#allocation7], 0 }
  0x12   :  { %24 = vsyncpa [#allocation10], 0 }
  0x13   :  { %25 = vsyncpa [#allocation13], 0 }
  0x14   :  { %26 = vsyncpa [#allocation8], 0  ;;  %s5136_s26 = smov 0   ;;  %s5138_s0 = smov 0  }
  0x15   :  { %s5140_s27 = smov 0   ;;  %s5142_s28 = smov 0  }
  0x16   :  { %s5144_s29 = smov 0  }
  0x17 LB: > { %5580 = sst [smem:[#allocation20_spill]] %s5033_s29  ;;  %s5044_s30 = smov [#allocation9]   ;;  %s5033_s29 = sphi %s5144_s29, %s32_s29   ;;  %s5029_s28 = sphi %s5142_s28, %s5606_s28   ;;  %s5025_s27 = sphi %s5140_s27, %s5605_s27   ;;  %s5021_s0 = sphi %s5138_s0, %s5604_s0   ;;  %s5017_s26 = sphi %s5136_s26, %s5603_s26  }
  0x18   : > { %s345_s13 = sshll.u32 %s5044_s30, 4  ;;  %s5571_s14 = sadd.s32 4294967295, %s5033_s29   ;;  %s346_s13 = int_to_ptr.vmem [resolvable:$true] %s345_s13 }
  0x19   : > { %p4035_p5 = scmp.ge.s32.totalorder %s5033_s29, 1  ;;  %p311_p6 = scmp.lt.s32.totalorder %s5033_s29, 5 }
  0x1a   : > { %p5166_p7 = scmp.eq.s32.totalorder %s5571_s14, 0  ;;  %s5584_s7 = sld [smem:[#allocation22_spill]] }
  0x1b   : > { %p5170_p8 = pnand %p4035_p5, %p311_p6 }
  0x1c   : > { %s5581_s15 = scalar_select %p5166_p7, 1, 0 }
  0x1d   : > { %s5582_s16 = scalar_select %p5170_p8, 1, 0 }
  0x1e   : > { %p4496_p9 = pneg %p5170_p8 }
  0x20   : > { %p5178_p10 = pnand %p5166_p7, %p4496_p9  ;;  %s4831_s20 = scalar_lea.hbm %s5584_s7, 8192 }
  0x21   : > { %p4832_p11 = scmp.ne.s32.totalorder %s5584_s7, %s4831_s20  ;;  %p4838_p1 = scmp.lt.u32.totalorder %s4831_s20, %s5584_s7 }
  0x22   : > { %p5190_p12 = pneg %p5178_p10 }
  0x24   : > { %p4834_p13 = pnand %p5190_p12, %p4832_p11 }
  0x26   : > { %p4835_p0 = pneg %p4834_p13 }
  0x28   : > { %p4840_p2 = pnand %p4838_p1, %p4835_p0 }
  0x2a   : > { %4843 = shalt.err (!%p4840_p2)
}
  0x2b   : > { %s4844_s30 = scalar_lea.vmem %s346_s13, 8192  ;;  %p4852_p6 = scmp.lt.s32.totalorder %s346_s13, %s346_s13 }
  0x2c   : > { %p4845_p3 = scmp.ne.s32.totalorder %s346_s13, %s4844_s30  ;;  %p4853_p9 = scmp.lt.s32.totalorder %s4844_s30, %s4844_s30 }
  0x2e   : > { %p4847_p4 = pnand %p4845_p3, %p5190_p12  ;;  %p4854_p7 = por %p4853_p9, %p4852_p6 }
  0x30   : > { %p4848_p5 = pneg %p4847_p4 }
  0x32   : > { %p4855_p8 = pnand %p4854_p7, %p4848_p5 }
  0x34   : > { %4858 = shalt.err (!%p4855_p8)
}
  0x35   : > { %s5574_s18 = smov 256   ;;  %s5575_s19 = smov 16  }
  0x36   : > { %4502 = dma.hbm_to_vmem [thread:$0]  (!%p5178_p10), %s5584_s7, 8192, %s346_s13, [#allocation10], %s5574_s18, %s5574_s18, %s5575_s19  }
  0x37   : > { %s41_s22 = sadd.s32 1, %s5025_s27  ;;  %s44_s24 = sadd.s32 1, %s5029_s28 }
  0x38   : > { %p42_p11 = scmp.ge.s32.totalorder %s41_s22, 2  ;;  %s5047_s25 = smov [#allocation6]  }
  0x39   : > { %s329_s30 = sshll.u32 %s5047_s25, 4  ;;  %s4859_s29 = scalar_lea.hbm %s5560_s5, 2048  ;;  %s330_s30 = int_to_ptr.vmem [resolvable:$true] %s329_s30 }
  0x3a   : > { %s5608_s22 = smov (%p42_p11, %s41_s22), 0  ;;  %s5610_s24 = smov (!%p42_p11, %s44_s24), %s5029_s28 }
  0x3b   : > { %5586 = sst [smem:[#allocation21_spill]] %s5608_s22  ;;  %p4860_p8 = scmp.ne.s32.totalorder %s5560_s5, %s4859_s29 }
  0x3c   : > { %p4866_p1 = scmp.lt.u32.totalorder %s4859_s29, %s5560_s5 }
  0x3d   : > { %p4862_p13 = pnand %p4860_p8, %p5190_p12 }
  0x3f   : > { %p4863_p0 = pneg %p4862_p13 }
  0x41   : > { %p4868_p2 = pnand %p4866_p1, %p4863_p0 }
  0x43   : > { %4871 = shalt.err (!%p4868_p2)
}
  0x44   : > { %s4872_s21 = scalar_lea.vmem %s330_s30, 2048  ;;  %p4880_p6 = scmp.lt.s32.totalorder %s330_s30, %s330_s30 }
  0x45   : > { %p4873_p3 = scmp.ne.s32.totalorder %s330_s30, %s4872_s21  ;;  %p4881_p9 = scmp.lt.s32.totalorder %s4872_s21, %s4872_s21 }
  0x47   : > { %p4875_p4 = pnand %p4873_p3, %p5190_p12  ;;  %p4882_p11 = por %p4881_p9, %p4880_p6 }
  0x49   : > { %p4876_p5 = pneg %p4875_p4 }
  0x4b   : > { %p4883_p7 = pnand %p4882_p11, %p4876_p5 }
  0x4d   : > { %4886 = shalt.err (!%p4883_p7)
}
  0x4e   : > { %s5048_s9 = smov 128   ;;  %s5049_s11 = smov 8  }
  0x4f   : > { %4499 = dma.hbm_to_vmem [thread:$0]  (!%p5178_p10), %s5560_s5, 2048, %s330_s30, [#allocation7], %s5048_s9, %s5048_s9, %s5049_s11  }
  0x50   : > { %p5587_p8 = scmp.ge.s32.totalorder %s5610_s24, 2  ;;  %s5050_s14 = smov [#allocation11]  }
  0x51   : > { %s358_s25 = sshll.u32 %s5050_s14, 4  ;;  %s5051_s13 = smov [#allocation12]   ;;  %s359_s25 = int_to_ptr.vmem [resolvable:$true] %s358_s25 }
  0x52   : > { %s5612_s24 = smov (%p5587_p8, %s5610_s24), 0  ;;  %s374_s20 = sshll.u32 %s5051_s13, 4  ;;  %s375_s20 = int_to_ptr.vmem [resolvable:$true] %s374_s20 }
  0x53   : > { %s4887_s19 = scalar_lea.hbm %s5563_s8, 8192 }
  0x54   : > { %p4888_p7 = scmp.ne.s32.totalorder %s5563_s8, %s4887_s19  ;;  %p4894_p1 = scmp.lt.u32.totalorder %s4887_s19, %s5563_s8 }
  0x56   : > { %p4890_p13 = pnand %p4888_p7, %p5190_p12 }
  0x58   : > { %p4891_p0 = pneg %p4890_p13 }
  0x5a   : > { %p4896_p2 = pnand %p4894_p1, %p4891_p0 }
  0x5c   : > { %4899 = shalt.err (!%p4896_p2)
}
  0x5d   : > { %s4900_s11 = scalar_lea.vmem %s359_s25, 8192  ;;  %p4908_p6 = scmp.lt.s32.totalorder %s359_s25, %s359_s25 }
  0x5e   : > { %p4901_p3 = scmp.ne.s32.totalorder %s359_s25, %s4900_s11  ;;  %p4909_p9 = scmp.lt.s32.totalorder %s4900_s11, %s4900_s11 }
  0x60   : > { %p4903_p4 = pnand %p4901_p3, %p5190_p12  ;;  %p4910_p11 = por %p4909_p9, %p4908_p6 }
  0x62   : > { %p4904_p5 = pneg %p4903_p4 }
  0x64   : > { %p4911_p8 = pnand %p4910_p11, %p4904_p5 }
  0x66   : > { %4914 = shalt.err (!%p4911_p8)
}
  0x67   : > { %s5588_s7 = smov 16   ;;  %s5589_s18 = smov 256  }
  0x68   : > { %4505 = dma.hbm_to_vmem [thread:$0]  (!%p5178_p10), %s5563_s8, 8192, %s359_s25, [#allocation10], %s5589_s18, %s5589_s18, %s5588_s7  }
  0x69   : > { %s4915_s14 = scalar_lea.hbm %s5565_s10, 32768 }
  0x6a   : > { %p4916_p7 = scmp.ne.s32.totalorder %s5565_s10, %s4915_s14  ;;  %p4922_p1 = scmp.lt.u32.totalorder %s4915_s14, %s5565_s10 }
  0x6c   : > { %p4918_p13 = pnand %p4916_p7, %p5190_p12 }
  0x6e   : > { %p4919_p0 = pneg %p4918_p13 }
  0x70   : > { %p4924_p2 = pnand %p4922_p1, %p4919_p0 }
  0x72   : > { %4927 = shalt.err (!%p4924_p2)
}
  0x73   : > { %s4928_s11 = scalar_lea.vmem %s375_s20, 32768  ;;  %p4936_p6 = scmp.lt.s32.totalorder %s375_s20, %s375_s20 }
  0x74   : > { %p4929_p3 = scmp.ne.s32.totalorder %s375_s20, %s4928_s11  ;;  %p4937_p9 = scmp.lt.s32.totalorder %s4928_s11, %s4928_s11 }
  0x76   : > { %p4931_p4 = pnand %p4929_p3, %p5190_p12  ;;  %p4938_p11 = por %p4937_p9, %p4936_p6 }
  0x78   : > { %p4932_p5 = pneg %p4931_p4 }
  0x7a   : > { %p4939_p8 = pnand %p4938_p11, %p4932_p5 }
  0x7c   : > { %4942 = shalt.err (!%p4939_p8)
}
  0x7d   : > { %s5052_s25 = smov 512   ;;  %s5053_s7 = smov 32  }
  0x7e   : > { %4508 = dma.hbm_to_vmem [thread:$0]  (!%p5178_p10), %s5565_s10, 32768, %s375_s20, [#allocation13], %s5052_s25, %s5052_s25, %s5053_s7  }
  0x7f   : > { %p5590_p7 = scmp.ne.s32.totalorder %s5582_s16, 0 }
  0x80   : > { %p5591_p13 = scmp.ne.s32.totalorder (!%p5590_p7), %s5581_s15, 0 }
  0x81   : > { %407 = sbr.rel (%p5590_p7) target bundleno = 2002 (0x7d2), region = 64 }
  0x88   : > { %5000 = dma.done.wait (%p5591_p13), [#allocation7], 2048  }
  0x89   : > { %5002 = vsyncadd (%p5591_p13), [#allocation7], 4294965248 }
  0x8a   : > { %5004 = dma.done.wait (%p5591_p13), [#allocation10], 16384  }
  0x8b   : > { %5006 = vsyncadd (%p5591_p13), [#allocation10], 4294950912 }
  0x8c   : > { %5008 = dma.done.wait (%p5591_p13), [#allocation13], 32768  }
  0x8d   : > { %5010 = vsyncadd (%p5591_p13), [#allocation13], 4294934528  ;;  %s4066_s16 = sshll.u32 %s5017_s26, 7  ;;  %v5054_v0 = vmov 0.0   ;;  %vm5055_vm0 = vmmov 0   ;;  %p457_p10 = scmp.lt.s32.totalorder %s5017_s26, 1  ;;  %v545_v31 = vlaneseq }
  0x8e   : > { %s5289_s17 = sld [smem:[#allocation5 + %s4066_s16]]   ;;  %s678_s23 = sadd.s32 1, %s4066_s16  ;;  %4470 = vmatprep.subr.bf16.mxu0 %v5054_v0  ;;  %4472 = vmatprep.mubr.msk.bf16.mxu0 %vm5055_vm0, %v5054_v0  ;;  %vm481_vm1 = vcmask 1043456   ;;  %v469_v1 = vld [vmem:[%s5558_s3] sm:$0xf]  ;;  %vm477_vm2 = vcmask 64512  }
  0x8f   : > { %s5291_s20 = sld [smem:[#allocation5 + %s678_s23]]  ;;  %v483_v2 = vsel %vm481_vm1, %v469_v1, 0  ;;  %v4600_v5 = vld [vmem:[#allocation6 + $0x4] ss:$8 sps:$4 sm:$0xff]   ;;  %v4602_v7 = vld [vmem:[#allocation6] ss:$8 sps:$4 sm:$0xff]  }
  0x90   : > { %s458_s19 = scalar_select %p457_p10, %s5017_s26, 1  ;;  %4471 = vmatpush3.bf16.msra.mxu0 %v483_v2  ;;  %635 = vmatprep.subr.bf16.mxu1 %v4600_v5  ;;  %v4603_v8 = vld [vmem:[#allocation6 + $0x14] ss:$8 sps:$4 sm:$0xff]   ;;  %v4605_v9 = vld [vmem:[#allocation6 + $0x10] ss:$8 sps:$4 sm:$0xff]   ;;  %v5056_v22 = vmov 0  }
  0x91   : > { %636 = vmatpush1.bf16.msra.mxu1 %v4602_v7  ;;  %v4606_v10 = vld [vmem:[#allocation6 + $0x24] ss:$8 sps:$4 sm:$0xff]   ;;  %v4608_v11 = vld [vmem:[#allocation6 + $0x20] ss:$8 sps:$4 sm:$0xff]   ;;  %v4609_v12 = vld [vmem:[#allocation6 + $0x34] ss:$8 sps:$4 sm:$0xff]   ;;  %667 = vmatprep.mubr.bf16.mxu1 %v5056_v22 }
  0x92   : > { %s4046_s12 = sshll.u32 %s458_s19, 3  ;;  %637 = vmatprep.subr.bf16.mxu1 %v4603_v8  ;;  %v4611_v13 = vld [vmem:[#allocation6 + $0x30] ss:$8 sps:$4 sm:$0xff]   ;;  %v4612_v14 = vld [vmem:[#allocation6 + $0x44] ss:$8 sps:$4 sm:$0xff]   ;;  %p680_p12 = scmp.eq.s32.totalorder %s5021_s0, 0 }
  0x93   : > { %s460_s21 = scalar_lea.vmem %s5556_s1, %s4046_s12  ;;  %s464_s11 = scalar_lea.vmem %s5557_s2, %s4046_s12  ;;  %v4614_v15 = vld [vmem:[#allocation6 + $0x40] ss:$8 sps:$4 sm:$0xff]   ;;  %v4615_v16 = vld [vmem:[#allocation6 + $0x54] ss:$8 sps:$4 sm:$0xff]   ;;  %v4617_v17 = vld [vmem:[#allocation6 + $0x50] ss:$8 sps:$4 sm:$0xff]  }
  0x94   : > { %v466_v3 = vld [vmem:[%s460_s21] sm:$0xff]  ;;  %v4618_v18 = vld [vmem:[#allocation6 + $0x64] ss:$8 sps:$4 sm:$0xff]   ;;  %v4620_v19 = vld [vmem:[#allocation6 + $0x60] ss:$8 sps:$4 sm:$0xff]   ;;  %p681_p0 = scmp.eq.s32.totalorder %s5017_s26, 0 }
  0x95   : > { %v5305_v4 = vld [vmem:[%s464_s11] sm:$0xff]  ;;  %v468_v6 = vpack.c.bf16 %v466_v3, %v466_v3  ;;  %638 = vmatpush1.bf16.msra.mxu1 %v4605_v9  ;;  %v5318_v32 = vshrl.u32 %v545_v31, 7 }
  0x96   : > { %639 = vmatprep.subr.bf16.mxu1 %v4606_v10  ;;  %v4621_v20 = vld [vmem:[#allocation6 + $0x74] ss:$8 sps:$4 sm:$0xff]   ;;  %v4623_v21 = vld [vmem:[#allocation6 + $0x70] ss:$8 sps:$4 sm:$0xff]   ;;  %p5313_p1 = pnand %p681_p0, %p680_p12 }
  0x97   : > { %4473 = vmatmul.mubr.msk.bf16.vlgmr.msra.gmra.mrb[0].mxu0 %vm477_vm2, %v468_v6  ;;  %v4048_v23 = vld [vmem:[%s5559_s4] ss:$0 sm:$0xff]  ;;  %v5321_v33 = vsub.s32 0, %v5318_v32  ;;  %v5327_v35 = vsub.s32 1, %v5318_v32  ;;  %v5057_v44 = vmov (!%p5313_p1), -1e+30  }
  0x98   : > { %v543_v34 = vld [vmem:[%s5561_s6] sm:$0x3]  ;;  %686 = vst [vmem:[#allocation2] sm:$0xff] (!%p5313_p1), %v5057_v44  ;;  %687 = vst [vmem:[#allocation2 + $0x8] sm:$0xff] (!%p5313_p1), %v5057_v44 }
  0x99   : > { %640 = vmatpush1.bf16.msra.mxu1 %v4608_v11  ;;  %v548_v36 = vrot.slane %v543_v34, %v5321_v33  ;;  %v552_v37 = vrot.slane %v543_v34, %v5327_v35 }
  0x9a   : > { %641 = vmatprep.subr.bf16.mxu1 %v4609_v12 }
  0x9d   : > { %642 = vmatpush1.bf16.msra.mxu1 %v4611_v13 }
  0x9e   : > { %643 = vmatprep.subr.bf16.mxu1 %v4612_v14 }
  0xa1   : > { %644 = vmatpush1.bf16.msra.mxu1 %v4614_v15 }
  0xa2   : > { %645 = vmatprep.subr.bf16.mxu1 %v4615_v16 }
  0xa5   : > { %646 = vmatpush1.bf16.msra.mxu1 %v4617_v17 }
  0xa6   : > { %647 = vmatprep.subr.bf16.mxu1 %v4618_v18 }
  0xa9   : > { %648 = vmatpush1.bf16.msra.mxu1 %v4620_v19 }
  0xaa   : > { %649 = vmatprep.subr.bf16.mxu1 %v4621_v20 }
  0xad   : > { %650 = vmatpush1.bf16.msra.mxu1 %v4623_v21 }
 0x16a   : > { %v519_v24 = vpop.f32.mrb[0].mxu0 }
 0x16b   : > { %v520_v25 = vadd.f32 %v4048_v23, %v519_v24  ;;  %v4474_v26 = vpop.f32.mrb[1].mxu0 }
 0x16c   : > { %v522_v27 = vpop.f32.mrb[2].mxu0 }
 0x16d   : > { %v525_v28 = vmax.f32 %v520_v25, 0.0  ;;  %v4475_v29 = vpop.f32.mrb[3].mxu0 }
 0x16f   : > { %v526_v30 = vpack.c.bf16 %v525_v28, %v525_v28 }
 0x171   : > { %668 = vmatmul.mubr.bf16.vlgmr.msra.gmra.mrb[0].mxu1 %v526_v30 }
 0x241   : > { %685 = sbr.rel (%p5313_p1) target bundleno = 584 (0x248), region = 84 }
 0x244   : > { %v669_v38 = vpop.f32.mrb[0].mxu1 }
 0x245   : > { %v5331_v39 = vadd.f32 %v669_v38, %v548_v36  ;;  %v671_v40 = vpop.f32.mrb[1].mxu1 }
 0x246   : > { %v5333_v41 = vadd.f32 %v671_v40, %v552_v37  ;;  %v673_v42 = vpop.f32.mrb[2].mxu1 }
 0x247   : > { %v674_v43 = vpop.f32.mrb[3].mxu1 }
 0x248 PF: > { %p4067_p2 = scmp.ne.s32.totalorder %s5021_s0, 0 }
 0x249   : > { %s691_s23 = sadd.s32 (!%p4067_p2), 1, %s5291_s20 }
 0x24a   : > { %690 = sbr.rel (%p4067_p2) target bundleno = 754 (0x2f2), region = 88  ;;  %p3954_p3 = scmp.ge.s32.totalorder (!%p4067_p2), %s5289_s17, %s691_s23 }
 0x251   : > { %3955 = sbr.rel (%p3954_p3) target bundleno = 754 (0x2f2), region = 137  ;;  %s5593_s19 = smov (!%p3954_p3), %s5289_s17 }
 0x258 LB: >> { %v5058_v45 = vmov 0   ;;  %v698_v46 = vstv %s5037_s19  ;;  %v5059_v47 = vmov -1e+30   ;;  %v5060_v54 = vmov 1966171168   ;;  %s720_s12 = sshra.s32 %s5037_s19, 3  ;;  %s5037_s19 = sphi %s5593_s19, %s695_s19  }
 0x259   : >> { %4624 = vset.pattern.permute.xlu0 %v5058_v45  ;;  %vm699_vm3 = vcmp.eq.s32.totalorder %v5305_v4, %v698_v46  ;;  %v733_v55 = vunpack.c.l.s4 %v5060_v54  ;;  %s723_s29 = sand.u32 7, %s5037_s19  ;;  %s4466_s15 = sshll.u32 %s720_s12, 4  ;;  %vm750_vm4 = vcmp.lt.s32.totalorder %v545_v31, 256 }
 0x25a   : >> { %v700_v48 = vsel %vm699_vm3, 0.0, %v5059_v47  ;;  %s726_s14 = sadd.s32 %s4466_s15, %s723_s29  ;;  %s695_s19 = sadd.s32 1, %s5037_s19  }
 0x25b   : >> { %703 = vperm.xlu0 %4624, %v700_v48   ;;  %v734_v60 = vunpack.c.0.s8 %v733_v55  ;;  %s727_s13 = scalar_lea.vmem [#allocation2], %s726_s14  ;;  %p694_p4 = scmp.ge.s32.totalorder %s695_s19, %s691_s23 }
 0x25c   : >> { %v728_v7 = vld [vmem:[%s727_s13] ss:$8 sm:$0x3] }
 0x25d   : >> { %v737_v1 = vsub.s32 %v734_v60, %v5318_v32 }
 0x2da   : >> { %v704_v49 = vpop.permute.xlu0 %703 }
 0x2db   : >> { %v706_v50 = vadd.f32 %v704_v49, %v5331_v39  ;;  %v707_v51 = vadd.f32 %v704_v49, %v5333_v41 }
 0x2dd   : >> { %v708_v52 = vrot.slane %v706_v50, 4  ;;  %v714_v53 = vrot.slane %v707_v51, 4 }
 0x2df   : >> { %v709_v56 = vmax.f32 %v706_v50, %v708_v52  ;;  %v715_v57 = vmax.f32 %v707_v51, %v714_v53 }
 0x2e1   : >> { %v710_v58 = vrot.slane %v709_v56, 2  ;;  %v716_v59 = vrot.slane %v715_v57, 2 }
 0x2e3   : >> { %v711_v61 = vmax.f32 %v709_v56, %v710_v58  ;;  %v717_v62 = vmax.f32 %v715_v57, %v716_v59 }
 0x2e5   : >> { %v712_v63 = vrot.slane %v711_v61, 1  ;;  %v718_v0 = vrot.slane %v717_v62, 1 }
 0x2e7   : >> { %v713_v2 = vmax.f32 %v711_v61, %v712_v63  ;;  %v719_v3 = vmax.f32 %v717_v62, %v718_v0 }
 0x2e9   : >> { %v731_v5 = vcombine.low %v713_v2, %v719_v3 }
 0x2eb   : >> { %v738_v6 = vrot.slane %v731_v5, %v737_v1  ;;  %697 = sbr.rel (!%p694_p4) target bundleno = 600 (0x258), region = 143 }
 0x2ed   : >> { %v745_v8 = vrot.slane %v738_v6, %v737_v1 }
 0x2ef   : >> { %v747_v9 = vmax.f32 %v728_v7, %v745_v8 }
 0x2f1   : >> { %752 = vst.msk [vmem:[%s727_s13] ss:$8 sm:$0x3] %vm750_vm4, %v747_v9 }
 0x2f2 PF: > { %p4070_p5 = scmp.ne.s32.totalorder %s5021_s0, 1 }
 0x2f3   : > { %p4071_p6 = scmp.ne.s32.totalorder (!%p4070_p5), %s5017_s26, 0 }
 0x2f4   : > { %757 = sbr.rel (%p4070_p5) target bundleno = 1967 (0x7af), region = 99 }
 0x2fb   : > { %760 = sbr.rel (%p4071_p6) target bundleno = 1044 (0x414), region = 103  ;;  %v4625_v10 = vld [vmem:[#allocation9 + $0x4] ss:$16 sps:$4 sm:$0xff] (!%p4071_p6)   ;;  %v5061_v11 = vmov (!%p4071_p6), -1e+30   ;;  %v770_v63 = vld [vmem:[#allocation2 + $0x8] sm:$0xff] (!%p4071_p6) }
 0x2fc   : > { %761 = vst [vmem:[#allocation14] sm:$0xff] (!%p4071_p6), %v5061_v11  ;;  %762 = vst [vmem:[#allocation14 + $0x8] sm:$0xff] (!%p4071_p6), %v5061_v11  ;;  %v4627_v12 = vld [vmem:[#allocation9 + $0xc] ss:$16 sps:$4 sm:$0xff] (!%p4071_p6)   ;;  %1157 = vmatprep.subr.bf16.mxu0 (!%p4071_p6), %v4625_v10  ;;  %v4629_v13 = vld [vmem:[#allocation9] ss:$16 sps:$4 sm:$0xff] (!%p4071_p6)   ;;  %v772_v0 = vpack.c.bf16 (!%p4071_p6), %v770_v63, %v770_v63 }
 0x2fd   : > { %763 = vst [vmem:[#allocation14 + $0x10] sm:$0xff] (!%p4071_p6), %v5061_v11  ;;  %764 = vst [vmem:[#allocation14 + $0x18] sm:$0xff] (!%p4071_p6), %v5061_v11  ;;  %v4630_v14 = vld [vmem:[#allocation9 + $0x8] ss:$16 sps:$4 sm:$0xff] (!%p4071_p6)   ;;  %1198 = vmatprep.subr.bf16.mxu1 (!%p4071_p6), %v4627_v12  ;;  %v4631_v15 = vld [vmem:[#allocation9 + $0x24] ss:$16 sps:$4 sm:$0xff] (!%p4071_p6)   ;;  %1158 = vmatpush1.bf16.msra.mxu0 (!%p4071_p6), %v4629_v13 }
 0x2fe   : > { %765 = vst [vmem:[#allocation14 + $0x20] sm:$0xff] (!%p4071_p6), %v5061_v11  ;;  %766 = vst [vmem:[#allocation14 + $0x28] sm:$0xff] (!%p4071_p6), %v5061_v11  ;;  %1199 = vmatpush1.bf16.msra.mxu1 (!%p4071_p6), %v4630_v14  ;;  %v4633_v16 = vld [vmem:[#allocation9 + $0x2c] ss:$16 sps:$4 sm:$0xff] (!%p4071_p6)   ;;  %v4635_v17 = vld [vmem:[#allocation9 + $0x20] ss:$16 sps:$4 sm:$0xff] (!%p4071_p6)   ;;  %1159 = vmatprep.subr.bf16.mxu0 (!%p4071_p6), %v4631_v15 }
 0x2ff   : > { %767 = vst [vmem:[#allocation14 + $0x30] sm:$0xff] (!%p4071_p6), %v5061_v11  ;;  %768 = vst [vmem:[#allocation14 + $0x38] sm:$0xff] (!%p4071_p6), %v5061_v11  ;;  %v4636_v18 = vld [vmem:[#allocation9 + $0x28] ss:$16 sps:$4 sm:$0xff] (!%p4071_p6)   ;;  %1200 = vmatprep.subr.bf16.mxu1 (!%p4071_p6), %v4633_v16  ;;  %v4637_v19 = vld [vmem:[#allocation9 + $0x44] ss:$16 sps:$4 sm:$0xff] (!%p4071_p6)   ;;  %1189 = vmatprep.mubr.bf16.mxu0 (!%p4071_p6), %v772_v0 }
 0x300   : > { %v4639_v20 = vld [vmem:[#allocation9 + $0x4c] ss:$16 sps:$4 sm:$0xff] (!%p4071_p6)   ;;  %v4641_v21 = vld [vmem:[#allocation9 + $0x40] ss:$16 sps:$4 sm:$0xff] (!%p4071_p6)   ;;  %v4642_v22 = vld [vmem:[#allocation9 + $0x48] ss:$16 sps:$4 sm:$0xff] (!%p4071_p6)   ;;  %1230 = vmatprep.mubr.bf16.mxu1 (!%p4071_p6), %v772_v0 }
 0x301   : > { %1160 = vmatpush1.bf16.msra.mxu0 (!%p4071_p6), %v4635_v17  ;;  %v4643_v23 = vld [vmem:[#allocation9 + $0x64] ss:$16 sps:$4 sm:$0xff] (!%p4071_p6)   ;;  %v4645_v24 = vld [vmem:[#allocation9 + $0x6c] ss:$16 sps:$4 sm:$0xff] (!%p4071_p6)   ;;  %v4647_v25 = vld [vmem:[#allocation9 + $0x60] ss:$16 sps:$4 sm:$0xff] (!%p4071_p6)  }
 0x302   : > { %1201 = vmatpush1.bf16.msra.mxu1 %v4636_v18  ;;  %1161 = vmatprep.subr.bf16.mxu0 %v4637_v19  ;;  %v4648_v26 = vld [vmem:[#allocation9 + $0x68] ss:$16 sps:$4 sm:$0xff]   ;;  %v4649_v27 = vld [vmem:[#allocation9 + $0x84] ss:$16 sps:$4 sm:$0xff]   ;;  %v4651_v28 = vld [vmem:[#allocation9 + $0x8c] ss:$16 sps:$4 sm:$0xff]  }
 0x303   : > { %1202 = vmatprep.subr.bf16.mxu1 %v4639_v20  ;;  %v4653_v29 = vld [vmem:[#allocation9 + $0x80] ss:$16 sps:$4 sm:$0xff]   ;;  %v4654_v30 = vld [vmem:[#allocation9 + $0x88] ss:$16 sps:$4 sm:$0xff]   ;;  %v4655_v34 = vld [vmem:[#allocation9 + $0xa4] ss:$16 sps:$4 sm:$0xff]  }
 0x304   : > { %v4657_v36 = vld [vmem:[#allocation9 + $0xac] ss:$16 sps:$4 sm:$0xff]   ;;  %v4659_v37 = vld [vmem:[#allocation9 + $0xa0] ss:$16 sps:$4 sm:$0xff]   ;;  %v4660_v38 = vld [vmem:[#allocation9 + $0xa8] ss:$16 sps:$4 sm:$0xff]  }
 0x305   : > { %1162 = vmatpush1.bf16.msra.mxu0 %v4641_v21  ;;  %v4661_v40 = vld [vmem:[#allocation9 + $0xc4] ss:$16 sps:$4 sm:$0xff]   ;;  %v4663_v42 = vld [vmem:[#allocation9 + $0xcc] ss:$16 sps:$4 sm:$0xff]   ;;  %v4665_v43 = vld [vmem:[#allocation9 + $0xc0] ss:$16 sps:$4 sm:$0xff]  }
 0x306   : > { %1203 = vmatpush1.bf16.msra.mxu1 %v4642_v22  ;;  %1163 = vmatprep.subr.bf16.mxu0 %v4643_v23  ;;  %v4666_v44 = vld [vmem:[#allocation9 + $0xc8] ss:$16 sps:$4 sm:$0xff]   ;;  %v4667_v45 = vld [vmem:[#allocation9 + $0xe4] ss:$16 sps:$4 sm:$0xff]   ;;  %v4669_v46 = vld [vmem:[#allocation9 + $0xec] ss:$16 sps:$4 sm:$0xff]  }
 0x307   : > { %1204 = vmatprep.subr.bf16.mxu1 %v4645_v24  ;;  %v4671_v47 = vld [vmem:[#allocation9 + $0xe0] ss:$16 sps:$4 sm:$0xff]   ;;  %v4672_v48 = vld [vmem:[#allocation9 + $0xe8] ss:$16 sps:$4 sm:$0xff]   ;;  %v4673_v49 = vld [vmem:[#allocation9 + $0x104] ss:$16 sps:$4 sm:$0xff]  }
 0x308   : > { %v4675_v50 = vld [vmem:[#allocation9 + $0x10c] ss:$16 sps:$4 sm:$0xff]   ;;  %v4677_v51 = vld [vmem:[#allocation9 + $0x100] ss:$16 sps:$4 sm:$0xff]   ;;  %v4678_v52 = vld [vmem:[#allocation9 + $0x108] ss:$16 sps:$4 sm:$0xff]  }
 0x309   : > { %1164 = vmatpush1.bf16.msra.mxu0 %v4647_v25  ;;  %v4679_v53 = vld [vmem:[#allocation9 + $0x124] ss:$16 sps:$4 sm:$0xff]   ;;  %v4681_v54 = vld [vmem:[#allocation9 + $0x12c] ss:$16 sps:$4 sm:$0xff]   ;;  %v4683_v55 = vld [vmem:[#allocation9 + $0x120] ss:$16 sps:$4 sm:$0xff]  }
 0x30a   : > { %1205 = vmatpush1.bf16.msra.mxu1 %v4648_v26  ;;  %1165 = vmatprep.subr.bf16.mxu0 %v4649_v27  ;;  %v4684_v56 = vld [vmem:[#allocation9 + $0x128] ss:$16 sps:$4 sm:$0xff]   ;;  %v4685_v57 = vld [vmem:[#allocation9 + $0x144] ss:$16 sps:$4 sm:$0xff]   ;;  %v4687_v58 = vld [vmem:[#allocation9 + $0x14c] ss:$16 sps:$4 sm:$0xff]  }
 0x30b   : > { %1206 = vmatprep.subr.bf16.mxu1 %v4651_v28  ;;  %v4689_v59 = vld [vmem:[#allocation9 + $0x140] ss:$16 sps:$4 sm:$0xff]   ;;  %v4690_v60 = vld [vmem:[#allocation9 + $0x148] ss:$16 sps:$4 sm:$0xff]   ;;  %v4691_v61 = vld [vmem:[#allocation9 + $0x164] ss:$16 sps:$4 sm:$0xff]  }
 0x30c   : > { %v4693_v62 = vld [vmem:[#allocation9 + $0x16c] ss:$16 sps:$4 sm:$0xff]   ;;  %v4695_v1 = vld [vmem:[#allocation9 + $0x160] ss:$16 sps:$4 sm:$0xff]   ;;  %v4696_v2 = vld [vmem:[#allocation9 + $0x168] ss:$16 sps:$4 sm:$0xff]  }
 0x30d   : > { %1166 = vmatpush1.bf16.msra.mxu0 %v4653_v29  ;;  %v4697_v3 = vld [vmem:[#allocation9 + $0x184] ss:$16 sps:$4 sm:$0xff]   ;;  %v4699_v5 = vld [vmem:[#allocation9 + $0x18c] ss:$16 sps:$4 sm:$0xff]   ;;  %v4701_v6 = vld [vmem:[#allocation9 + $0x180] ss:$16 sps:$4 sm:$0xff]  }
 0x30e   : > { %1207 = vmatpush1.bf16.msra.mxu1 %v4654_v30  ;;  %1167 = vmatprep.subr.bf16.mxu0 %v4655_v34  ;;  %v4702_v7 = vld [vmem:[#allocation9 + $0x188] ss:$16 sps:$4 sm:$0xff]   ;;  %v4703_v8 = vld [vmem:[#allocation9 + $0x1a4] ss:$16 sps:$4 sm:$0xff]   ;;  %v4705_v9 = vld [vmem:[#allocation9 + $0x1ac] ss:$16 sps:$4 sm:$0xff]  }
 0x30f   : > { %1208 = vmatprep.subr.bf16.mxu1 %v4657_v36  ;;  %v4707_v10 = vld [vmem:[#allocation9 + $0x1a0] ss:$16 sps:$4 sm:$0xff]   ;;  %v4708_v11 = vld [vmem:[#allocation9 + $0x1a8] ss:$16 sps:$4 sm:$0xff]   ;;  %v4709_v12 = vld [vmem:[#allocation9 + $0x1c4] ss:$16 sps:$4 sm:$0xff]  }
 0x310   : > { %v4711_v13 = vld [vmem:[#allocation9 + $0x1cc] ss:$16 sps:$4 sm:$0xff]   ;;  %v4713_v14 = vld [vmem:[#allocation9 + $0x1c0] ss:$16 sps:$4 sm:$0xff]   ;;  %v4714_v15 = vld [vmem:[#allocation9 + $0x1c8] ss:$16 sps:$4 sm:$0xff]  }
 0x311   : > { %1168 = vmatpush1.bf16.msra.mxu0 %v4659_v37  ;;  %v4715_v16 = vld [vmem:[#allocation9 + $0x1e4] ss:$16 sps:$4 sm:$0xff]   ;;  %v4717_v17 = vld [vmem:[#allocation9 + $0x1ec] ss:$16 sps:$4 sm:$0xff]   ;;  %v4719_v18 = vld [vmem:[#allocation9 + $0x1e0] ss:$16 sps:$4 sm:$0xff]  }
 0x312   : > { %1209 = vmatpush1.bf16.msra.mxu1 %v4660_v38  ;;  %1169 = vmatprep.subr.bf16.mxu0 %v4661_v40  ;;  %v4720_v19 = vld [vmem:[#allocation9 + $0x1e8] ss:$16 sps:$4 sm:$0xff]   ;;  %v769_v20 = vld [vmem:[#allocation2] sm:$0xff] }
 0x313   : > { %1210 = vmatprep.subr.bf16.mxu1 %v4663_v42  ;;  %v771_v21 = vpack.c.bf16 %v769_v20, %v769_v20 }
 0x315   : > { %1170 = vmatpush1.bf16.msra.mxu0 %v4665_v43 }
 0x316   : > { %1211 = vmatpush1.bf16.msra.mxu1 %v4666_v44  ;;  %1171 = vmatprep.subr.bf16.mxu0 %v4667_v45 }
 0x317   : > { %1212 = vmatprep.subr.bf16.mxu1 %v4669_v46 }
 0x319   : > { %1172 = vmatpush1.bf16.msra.mxu0 %v4671_v47 }
 0x31a   : > { %1213 = vmatpush1.bf16.msra.mxu1 %v4672_v48  ;;  %1173 = vmatprep.subr.bf16.mxu0 %v4673_v49 }
 0x31b   : > { %1214 = vmatprep.subr.bf16.mxu1 %v4675_v50 }
 0x31d   : > { %1174 = vmatpush1.bf16.msra.mxu0 %v4677_v51 }
 0x31e   : > { %1215 = vmatpush1.bf16.msra.mxu1 %v4678_v52  ;;  %1175 = vmatprep.subr.bf16.mxu0 %v4679_v53 }
 0x31f   : > { %1216 = vmatprep.subr.bf16.mxu1 %v4681_v54 }
 0x321   : > { %1176 = vmatpush1.bf16.msra.mxu0 %v4683_v55 }
 0x322   : > { %1217 = vmatpush1.bf16.msra.mxu1 %v4684_v56  ;;  %1177 = vmatprep.subr.bf16.mxu0 %v4685_v57 }
 0x323   : > { %1218 = vmatprep.subr.bf16.mxu1 %v4687_v58 }
 0x325   : > { %1178 = vmatpush1.bf16.msra.mxu0 %v4689_v59 }
 0x326   : > { %1219 = vmatpush1.bf16.msra.mxu1 %v4690_v60  ;;  %1179 = vmatprep.subr.bf16.mxu0 %v4691_v61 }
 0x327   : > { %1220 = vmatprep.subr.bf16.mxu1 %v4693_v62 }
 0x329   : > { %1180 = vmatpush1.bf16.msra.mxu0 %v4695_v1 }
 0x32a   : > { %1221 = vmatpush1.bf16.msra.mxu1 %v4696_v2  ;;  %1181 = vmatprep.subr.bf16.mxu0 %v4697_v3 }
 0x32b   : > { %1222 = vmatprep.subr.bf16.mxu1 %v4699_v5 }
 0x32d   : > { %1182 = vmatpush1.bf16.msra.mxu0 %v4701_v6 }
 0x32e   : > { %1223 = vmatpush1.bf16.msra.mxu1 %v4702_v7  ;;  %1183 = vmatprep.subr.bf16.mxu0 %v4703_v8 }
 0x32f   : > { %1224 = vmatprep.subr.bf16.mxu1 %v4705_v9 }
 0x331   : > { %1184 = vmatpush1.bf16.msra.mxu0 %v4707_v10 }
 0x332   : > { %1225 = vmatpush1.bf16.msra.mxu1 %v4708_v11  ;;  %1185 = vmatprep.subr.bf16.mxu0 %v4709_v12 }
 0x333   : > { %1226 = vmatprep.subr.bf16.mxu1 %v4711_v13 }
 0x335   : > { %1186 = vmatpush1.bf16.msra.mxu0 %v4713_v14 }
 0x336   : > { %1227 = vmatpush1.bf16.msra.mxu1 %v4714_v15  ;;  %1187 = vmatprep.subr.bf16.mxu0 %v4715_v16 }
 0x337   : > { %1228 = vmatprep.subr.bf16.mxu1 %v4717_v17 }
 0x339   : > { %1188 = vmatpush1.bf16.msra.mxu0 %v4719_v18 }
 0x33a   : > { %1229 = vmatpush1.bf16.msra.mxu1 %v4720_v19 }
 0x33c   : > { %1190 = vmatmul.mubr.bf16.vlgmr.msra.gmra.mrb[0].mxu0 %v771_v21 }
 0x33d   : > { %1231 = vmatmul.mubr.bf16.vlgmr.msra.gmra.mrb[0].mxu1 %v771_v21 }
 0x40f   : > { %v1191_v22 = vpop.f32.mrb[0].mxu0 }
 0x410   : > { %v1232_v23 = vpop.f32.mrb[0].mxu1  ;;  %1239 = vst [vmem:[#allocation3] sm:$0xff] %v1191_v22  ;;  %v1193_v24 = vpop.f32.mrb[1].mxu0 }
 0x411   : > { %1241 = vst [vmem:[#allocation3 + $0x10] sm:$0xff] %v1232_v23  ;;  %v1234_v25 = vpop.f32.mrb[1].mxu1  ;;  %1240 = vst [vmem:[#allocation3 + $0x8] sm:$0xff] %v1193_v24  ;;  %v1195_v26 = vpop.f32.mrb[2].mxu0 }
 0x412   : > { %1242 = vst [vmem:[#allocation3 + $0x18] sm:$0xff] %v1234_v25  ;;  %v1236_v27 = vpop.f32.mrb[2].mxu1  ;;  %v1196_v28 = vpop.f32.mrb[3].mxu0 }
 0x413   : > { %v1237_v29 = vpop.f32.mrb[3].mxu1 }
 0x414 PF: > { %v4722_v30 = vld [vmem:[#allocation11 + $0x4] ss:$16 sps:$4 sm:$0xff]   ;;  %v1260_v34 = vpack.c.bf16 %v5333_v41, %v5333_v41  ;;  %v5062_v36 = vmov 0   ;;  %v4724_v37 = vld [vmem:[#allocation11] ss:$16 sps:$4 sm:$0xff]   ;;  %s5594_s21 = sld [smem:[#allocation23_spill]] }
 0x415   : > { %4721 = vset.pattern.permute.xlu0 %v5062_v36  ;;  %1645 = vmatprep.subr.bf16.mxu0 %v4722_v30  ;;  %v4725_v38 = vld [vmem:[#allocation11 + $0xc] ss:$16 sps:$4 sm:$0xff]   ;;  %v4727_v40 = vld [vmem:[#allocation11 + $0x8] ss:$16 sps:$4 sm:$0xff]   ;;  %v4728_v42 = vld [vmem:[#allocation11 + $0x24] ss:$16 sps:$4 sm:$0xff]  }
 0x416   : > { %1246 = vperm.xlu0 %4721, %v5305_v4   ;;  %1646 = vmatpush1.bf16.msra.mxu0 %v4724_v37  ;;  %v4730_v43 = vld [vmem:[#allocation11 + $0x20] ss:$16 sps:$4 sm:$0xff]   ;;  %v4731_v44 = vld [vmem:[#allocation11 + $0x2c] ss:$16 sps:$4 sm:$0xff]   ;;  %v4733_v45 = vld [vmem:[#allocation11 + $0x28] ss:$16 sps:$4 sm:$0xff]  }
 0x417   : > { %1677 = vmatprep.mubr.bf16.mxu0 %v1260_v34  ;;  %1686 = vmatprep.subr.bf16.mxu1 %v4725_v38  ;;  %v4734_v41 = vld [vmem:[#allocation11 + $0x44] ss:$16 sps:$4 sm:$0xff]   ;;  %v4736_v46 = vld [vmem:[#allocation11 + $0x40] ss:$16 sps:$4 sm:$0xff]   ;;  %v4737_v47 = vld [vmem:[#allocation11 + $0x4c] ss:$16 sps:$4 sm:$0xff]  }
 0x418   : > { %1718 = vmatprep.mubr.bf16.mxu1 %v1260_v34  ;;  %1687 = vmatpush1.bf16.msra.mxu1 %v4727_v40  ;;  %v4740_v48 = vld [vmem:[#allocation11 + $0x64] ss:$16 sps:$4 sm:$0xff]   ;;  %v4739_v49 = vld [vmem:[#allocation11 + $0x48] ss:$16 sps:$4 sm:$0xff]   ;;  %v4743_v50 = vld [vmem:[#allocation11 + $0x6c] ss:$16 sps:$4 sm:$0xff]  }
 0x419   : > { %1647 = vmatprep.subr.bf16.mxu0 %v4728_v42  ;;  %1688 = vmatprep.subr.bf16.mxu1 %v4731_v44  ;;  %v4742_v51 = vld [vmem:[#allocation11 + $0x60] ss:$16 sps:$4 sm:$0xff]   ;;  %v4746_v52 = vld [vmem:[#allocation11 + $0x84] ss:$16 sps:$4 sm:$0xff]   ;;  %v4745_v53 = vld [vmem:[#allocation11 + $0x68] ss:$16 sps:$4 sm:$0xff]  }
 0x41a   : > { %1648 = vmatpush1.bf16.msra.mxu0 %v4730_v43  ;;  %v4749_v54 = vld [vmem:[#allocation11 + $0x8c] ss:$16 sps:$4 sm:$0xff]   ;;  %v4748_v55 = vld [vmem:[#allocation11 + $0x80] ss:$16 sps:$4 sm:$0xff]   ;;  %v4752_v56 = vld [vmem:[#allocation11 + $0xa4] ss:$16 sps:$4 sm:$0xff]  }
 0x41b   : > { %1649 = vmatprep.subr.bf16.mxu0 %v4734_v41  ;;  %v4751_v57 = vld [vmem:[#allocation11 + $0x88] ss:$16 sps:$4 sm:$0xff]   ;;  %v4755_v58 = vld [vmem:[#allocation11 + $0xac] ss:$16 sps:$4 sm:$0xff]   ;;  %v4754_v59 = vld [vmem:[#allocation11 + $0xa0] ss:$16 sps:$4 sm:$0xff]  }
 0x41c   : > { %1689 = vmatpush1.bf16.msra.mxu1 %v4733_v45  ;;  %v4758_v60 = vld [vmem:[#allocation11 + $0xc4] ss:$16 sps:$4 sm:$0xff]   ;;  %v4757_v61 = vld [vmem:[#allocation11 + $0xa8] ss:$16 sps:$4 sm:$0xff]   ;;  %v4761_v62 = vld [vmem:[#allocation11 + $0xcc] ss:$16 sps:$4 sm:$0xff]  }
 0x41d   : > { %1690 = vmatprep.subr.bf16.mxu1 %v4737_v47  ;;  %v4760_v63 = vld [vmem:[#allocation11 + $0xc0] ss:$16 sps:$4 sm:$0xff]   ;;  %v4764_v0 = vld [vmem:[#allocation11 + $0xe4] ss:$16 sps:$4 sm:$0xff]   ;;  %v4763_v1 = vld [vmem:[#allocation11 + $0xc8] ss:$16 sps:$4 sm:$0xff]  }
 0x41e   : > { %1650 = vmatpush1.bf16.msra.mxu0 %v4736_v46  ;;  %v4767_v2 = vld [vmem:[#allocation11 + $0xec] ss:$16 sps:$4 sm:$0xff]   ;;  %v4766_v3 = vld [vmem:[#allocation11 + $0xe0] ss:$16 sps:$4 sm:$0xff]   ;;  %v4770_v5 = vld [vmem:[#allocation11 + $0x104] ss:$16 sps:$4 sm:$0xff]  }
 0x41f   : > { %1651 = vmatprep.subr.bf16.mxu0 %v4740_v48  ;;  %v4769_v6 = vld [vmem:[#allocation11 + $0xe8] ss:$16 sps:$4 sm:$0xff]   ;;  %v4773_v7 = vld [vmem:[#allocation11 + $0x10c] ss:$16 sps:$4 sm:$0xff]   ;;  %v4772_v8 = vld [vmem:[#allocation11 + $0x100] ss:$16 sps:$4 sm:$0xff]  }
 0x420   : > { %1691 = vmatpush1.bf16.msra.mxu1 %v4739_v49  ;;  %v4776_v9 = vld [vmem:[#allocation11 + $0x124] ss:$16 sps:$4 sm:$0xff]   ;;  %v4775_v10 = vld [vmem:[#allocation11 + $0x108] ss:$16 sps:$4 sm:$0xff]   ;;  %v4779_v11 = vld [vmem:[#allocation11 + $0x12c] ss:$16 sps:$4 sm:$0xff]  }
 0x421   : > { %1692 = vmatprep.subr.bf16.mxu1 %v4743_v50  ;;  %v4778_v12 = vld [vmem:[#allocation11 + $0x120] ss:$16 sps:$4 sm:$0xff]   ;;  %v4782_v13 = vld [vmem:[#allocation11 + $0x144] ss:$16 sps:$4 sm:$0xff]   ;;  %v4781_v14 = vld [vmem:[#allocation11 + $0x128] ss:$16 sps:$4 sm:$0xff]  }
 0x422   : > { %1652 = vmatpush1.bf16.msra.mxu0 %v4742_v51  ;;  %v4785_v15 = vld [vmem:[#allocation11 + $0x14c] ss:$16 sps:$4 sm:$0xff]   ;;  %v4784_v16 = vld [vmem:[#allocation11 + $0x140] ss:$16 sps:$4 sm:$0xff]   ;;  %v4788_v17 = vld [vmem:[#allocation11 + $0x164] ss:$16 sps:$4 sm:$0xff]  }
 0x423   : > { %1653 = vmatprep.subr.bf16.mxu0 %v4746_v52  ;;  %v4787_v18 = vld [vmem:[#allocation11 + $0x148] ss:$16 sps:$4 sm:$0xff]   ;;  %v4791_v19 = vld [vmem:[#allocation11 + $0x16c] ss:$16 sps:$4 sm:$0xff]   ;;  %v4790_v20 = vld [vmem:[#allocation11 + $0x160] ss:$16 sps:$4 sm:$0xff]  }
 0x424   : > { %1693 = vmatpush1.bf16.msra.mxu1 %v4745_v53  ;;  %v4794_v21 = vld [vmem:[#allocation11 + $0x184] ss:$16 sps:$4 sm:$0xff]   ;;  %v4793_v25 = vld [vmem:[#allocation11 + $0x168] ss:$16 sps:$4 sm:$0xff]   ;;  %v4797_v28 = vld [vmem:[#allocation11 + $0x18c] ss:$16 sps:$4 sm:$0xff]  }
 0x425   : > { %1694 = vmatprep.subr.bf16.mxu1 %v4749_v54  ;;  %v5367_v22 = vld [vmem:[#allocation12] sm:$0xff]  ;;  %v4799_v37 = vld [vmem:[#allocation11 + $0x188] ss:$16 sps:$4 sm:$0xff]   ;;  %v4803_v38 = vld [vmem:[#allocation11 + $0x1ac] ss:$16 sps:$4 sm:$0xff]   ;;  %s5595_s11 = sld [smem:[#allocation24_spill]] }
 0x426   : > { %1654 = vmatpush1.bf16.msra.mxu0 %v4748_v55  ;;  %v5369_v23 = vld [vmem:[#allocation12 + $0x20] sm:$0xff]  ;;  %v4805_v43 = vld [vmem:[#allocation11 + $0x1a8] ss:$16 sps:$4 sm:$0xff]   ;;  %v4809_v44 = vld [vmem:[#allocation11 + $0x1cc] ss:$16 sps:$4 sm:$0xff]   ;;  %s3764_s25 = sadd.s32 1, %s5291_s20 }
 0x427   : > { %1655 = vmatprep.subr.bf16.mxu0 %v4752_v56  ;;  %v5371_v24 = vld [vmem:[#allocation12 + $0x400] sm:$0xff]  ;;  %v4204_v26 = vcombine.low %v5367_v22, %v5369_v23  ;;  %v4811_v46 = vld [vmem:[#allocation11 + $0x1c8] ss:$16 sps:$4 sm:$0xff]   ;;  %v4815_v49 = vld [vmem:[#allocation11 + $0x1ec] ss:$16 sps:$4 sm:$0xff]   ;;  %v1259_v56 = vpack.c.bf16 %v5331_v39, %v5331_v39  ;;  %v1244_v39 = vand.u32 127, %v545_v31  ;;  %p3959_p9 = scmp.ge.s32.totalorder %s5289_s17, %s3764_s25 }
 0x428   : > { %1695 = vmatpush1.bf16.msra.mxu1 %v4751_v57  ;;  %v5375_v27 = vld [vmem:[#allocation12 + $0x420] sm:$0xff]  ;;  %v1252_v47 = vld [vmem:[#allocation3 + $0x8] sm:$0xff]  ;;  %v1254_v51 = vld [vmem:[#allocation3 + $0x18] sm:$0xff] }
 0x429   : > { %1696 = vmatprep.subr.bf16.mxu1 %v4755_v58  ;;  %v4332_v29 = vcombine.low %v5371_v24, %v5375_v27  ;;  %v4796_v30 = vld [vmem:[#allocation11 + $0x180] ss:$16 sps:$4 sm:$0xff]   ;;  %v4800_v34 = vld [vmem:[#allocation11 + $0x1a4] ss:$16 sps:$4 sm:$0xff]   ;;  %v1256_v53 = vpack.c.bf16 %v1252_v47, %v1252_v47  ;;  %v4817_v55 = vld [vmem:[#allocation11 + $0x1e8] ss:$16 sps:$4 sm:$0xff]   ;;  %v1258_v57 = vpack.c.bf16 %v1254_v51, %v1254_v51 }
 0x42a   : > { %1656 = vmatpush1.bf16.msra.mxu0 %v4754_v59  ;;  %v4802_v40 = vld [vmem:[#allocation11 + $0x1a0] ss:$16 sps:$4 sm:$0xff]   ;;  %v4806_v42 = vld [vmem:[#allocation11 + $0x1c4] ss:$16 sps:$4 sm:$0xff]  }
 0x42b   : > { %1657 = vmatprep.subr.bf16.mxu0 %v4758_v60  ;;  %v4808_v45 = vld [vmem:[#allocation11 + $0x1c0] ss:$16 sps:$4 sm:$0xff]   ;;  %v4812_v41 = vld [vmem:[#allocation11 + $0x1e4] ss:$16 sps:$4 sm:$0xff]   ;;  %v4205_v60 = vcombine.high %v5367_v22, %v5369_v23 }
 0x42c   : > { %1697 = vmatpush1.bf16.msra.mxu1 %v4757_v61  ;;  %v1251_v48 = vld [vmem:[#allocation3] sm:$0xff]  ;;  %v1253_v52 = vld [vmem:[#allocation3 + $0x10] sm:$0xff] }
 0x42d   : > { %1698 = vmatprep.subr.bf16.mxu1 %v4761_v62  ;;  %v4814_v50 = vld [vmem:[#allocation11 + $0x1e0] ss:$16 sps:$4 sm:$0xff]   ;;  %v1255_v54 = vpack.c.bf16 %v1251_v48, %v1251_v48  ;;  %v1257_v58 = vpack.c.bf16 %v1253_v52, %v1253_v52  ;;  %v4333_v62 = vcombine.high %v5371_v24, %v5375_v27 }
 0x42e   : > { %1658 = vmatpush1.bf16.msra.mxu0 %v4760_v63  ;;  %v1866_v63 = vld [vmem:[#allocation12 + $0x40] sm:$0xff] }
 0x42f   : > { %1659 = vmatprep.subr.bf16.mxu0 %v4764_v0  ;;  %v1731_v59 = vsel %vm481_vm1, %v1255_v54, 0  ;;  %v1737_v61 = vsel %vm481_vm1, %v1257_v58, 0  ;;  %v1890_v24 = vld [vmem:[#allocation12 + $0x100] sm:$0xff] }
 0x430   : > { %1699 = vmatpush1.bf16.msra.mxu1 %v4763_v1  ;;  %v1870_v1 = vld [vmem:[#allocation12 + $0x60] sm:$0xff] }
 0x431   : > { %1700 = vmatprep.subr.bf16.mxu1 %v4767_v2  ;;  %v1994_v2 = vld [vmem:[#allocation12 + $0x440] sm:$0xff]  ;;  %v4212_v31 = vcombine.low %v1866_v63, %v1870_v1 }
 0x432   : > { %1660 = vmatpush1.bf16.msra.mxu0 %v4766_v3  ;;  %v1998_v3 = vld [vmem:[#allocation12 + $0x460] sm:$0xff] }
 0x433   : > { %1661 = vmatprep.subr.bf16.mxu0 %v4770_v5  ;;  %v5063_v5 = vmov 0.0   ;;  %v2022_v27 = vld [vmem:[#allocation12 + $0x520] sm:$0xff] }
 0x434   : > { %1701 = vmatpush1.bf16.msra.mxu1 %v4769_v6  ;;  %v1910_v47 = vld [vmem:[#allocation12 + $0x1a0] sm:$0xff] }
 0x435   : > { %1702 = vmatprep.subr.bf16.mxu1 %v4773_v7  ;;  %v2034_v48 = vld [vmem:[#allocation12 + $0x580] sm:$0xff] }
 0x436   : > { %1662 = vmatpush1.bf16.msra.mxu0 %v4772_v8  ;;  %v4213_v8 = vcombine.high %v1866_v63, %v1870_v1  ;;  %v1914_v54 = vld [vmem:[#allocation12 + $0x1c0] sm:$0xff] }
 0x437   : > { %1663 = vmatprep.subr.bf16.mxu0 %v4776_v9  ;;  %v4341_v9 = vcombine.high %v1994_v2, %v1998_v3  ;;  %v2050_v63 = vld [vmem:[#allocation12 + $0x600] sm:$0xff] }
 0x438   : > { %1703 = vmatpush1.bf16.msra.mxu1 %v4775_v10  ;;  %v1874_v10 = vld [vmem:[#allocation12 + $0x80] sm:$0xff] }
 0x439   : > { %1704 = vmatprep.subr.bf16.mxu1 %v4779_v11  ;;  %v1878_v11 = vld [vmem:[#allocation12 + $0xa0] sm:$0xff] }
 0x43a   : > { %1664 = vmatpush1.bf16.msra.mxu0 %v4778_v12  ;;  %v2002_v12 = vld [vmem:[#allocation12 + $0x480] sm:$0xff] }
 0x43b   : > { %1665 = vmatprep.subr.bf16.mxu0 %v4782_v13  ;;  %v2006_v13 = vld [vmem:[#allocation12 + $0x4a0] sm:$0xff] }
 0x43c   : > { %1705 = vmatpush1.bf16.msra.mxu1 %v4781_v14  ;;  %v4221_v14 = vcombine.high %v1874_v10, %v1878_v11 }
 0x43d   : > { %1706 = vmatprep.subr.bf16.mxu1 %v4785_v15  ;;  %v4349_v15 = vcombine.high %v2002_v12, %v2006_v13 }
 0x43e   : > { %1666 = vmatpush1.bf16.msra.mxu0 %v4784_v16  ;;  %v1882_v16 = vld [vmem:[#allocation12 + $0xc0] sm:$0xff] }
 0x43f   : > { %1667 = vmatprep.subr.bf16.mxu0 %v4788_v17  ;;  %v1886_v17 = vld [vmem:[#allocation12 + $0xe0] sm:$0xff] }
 0x440   : > { %1707 = vmatpush1.bf16.msra.mxu1 %v4787_v18  ;;  %v2010_v18 = vld [vmem:[#allocation12 + $0x4c0] sm:$0xff]  ;;  %v4229_v22 = vcombine.high %v1882_v16, %v1886_v17 }
 0x441   : > { %1708 = vmatprep.subr.bf16.mxu1 %v4791_v19  ;;  %v2014_v19 = vld [vmem:[#allocation12 + $0x4e0] sm:$0xff] }
 0x442   : > { %1668 = vmatpush1.bf16.msra.mxu0 %v4790_v20  ;;  %v4220_v20 = vcombine.low %v1874_v10, %v1878_v11  ;;  %v4357_v23 = vcombine.high %v2010_v18, %v2014_v19 }
 0x443   : > { %1669 = vmatprep.subr.bf16.mxu0 %v4794_v21  ;;  %v4348_v21 = vcombine.low %v2002_v12, %v2006_v13 }
 0x444   : > { %1709 = vmatpush1.bf16.msra.mxu1 %v4793_v25  ;;  %v1894_v25 = vld [vmem:[#allocation12 + $0x120] sm:$0xff] }
 0x445   : > { %1710 = vmatprep.subr.bf16.mxu1 %v4797_v28  ;;  %v4228_v28 = vcombine.low %v1882_v16, %v1886_v17 }
 0x446   : > { %1670 = vmatpush1.bf16.msra.mxu0 %v4796_v30  ;;  %v4237_v30 = vcombine.high %v1890_v24, %v1894_v25 }
 0x447   : > { %1671 = vmatprep.subr.bf16.mxu0 %v4800_v34 }
 0x448   : > { %1711 = vmatpush1.bf16.msra.mxu1 %v4799_v37  ;;  %v1898_v37 = vld [vmem:[#allocation12 + $0x140] sm:$0xff] }
 0x449   : > { %1712 = vmatprep.subr.bf16.mxu1 %v4803_v38  ;;  %v1902_v38 = vld [vmem:[#allocation12 + $0x160] sm:$0xff] }
 0x44a   : > { %1672 = vmatpush1.bf16.msra.mxu0 %v4802_v40  ;;  %v2026_v40 = vld [vmem:[#allocation12 + $0x540] sm:$0xff] }
 0x44b   : > { %1673 = vmatprep.subr.bf16.mxu0 %v4806_v42  ;;  %v2030_v42 = vld [vmem:[#allocation12 + $0x560] sm:$0xff] }
 0x44c   : > { %1713 = vmatpush1.bf16.msra.mxu1 %v4805_v43  ;;  %v4236_v43 = vcombine.low %v1890_v24, %v1894_v25  ;;  %v4372_v51 = vcombine.low %v2026_v40, %v2030_v42 }
 0x44d   : > { %1714 = vmatprep.subr.bf16.mxu1 %v4809_v44 }
 0x44e   : > { %1674 = vmatpush1.bf16.msra.mxu0 %v4808_v45  ;;  %v4245_v45 = vcombine.high %v1898_v37, %v1902_v38 }
 0x44f   : > { %1675 = vmatprep.subr.bf16.mxu0 %v4812_v41  ;;  %v4373_v41 = vcombine.high %v2026_v40, %v2030_v42 }
 0x450   : > { %1715 = vmatpush1.bf16.msra.mxu1 %v4811_v46  ;;  %v1906_v46 = vld [vmem:[#allocation12 + $0x180] sm:$0xff] }
 0x451   : > { %1716 = vmatprep.subr.bf16.mxu1 %v4815_v49  ;;  %v2038_v49 = vld [vmem:[#allocation12 + $0x5a0] sm:$0xff]  ;;  %v4253_v52 = vcombine.high %v1906_v46, %v1910_v47  ;;  %v4252_v58 = vcombine.low %v1906_v46, %v1910_v47 }
 0x452   : > { %1676 = vmatpush1.bf16.msra.mxu0 %v4814_v50  ;;  %v4244_v50 = vcombine.low %v1898_v37, %v1902_v38 }
 0x453   : > { %4200 = vmatprep.subr.msk.bf16.mxu0 %vm481_vm1, %v1256_v53  ;;  %v4381_v53 = vcombine.high %v2034_v48, %v2038_v49 }
 0x454   : > { %1717 = vmatpush1.bf16.msra.mxu1 %v4817_v55  ;;  %v1918_v55 = vld [vmem:[#allocation12 + $0x1e0] sm:$0xff] }
 0x455   : > { %1678 = vmatmul.mubr.bf16.vlgmr.msra.gmra.mrb[0].mxu0 %v1259_v56  ;;  %4202 = vmatprep.subr.msk.bf16.mxu1 %vm481_vm1, %v1258_v57  ;;  %v2046_v57 = vld [vmem:[#allocation12 + $0x5e0] sm:$0xff]  ;;  %v4260_v1 = vcombine.low %v1914_v54, %v1918_v55 }
 0x456   : > { %1743 = vmatpush1.bf16.msra.mxu0 %v1731_v59  ;;  %1774 = vmatprep.mubr.bf16.mxu0 %v5062_v36  ;;  %v4380_v59 = vcombine.low %v2034_v48, %v2038_v49 }
 0x457   : > { %1719 = vmatmul.mubr.bf16.vlgmr.msra.gmra.mrb[0].mxu1 %v1259_v56  ;;  %3436 = vmatprep.subr.bf16.mxu0 %v4205_v60  ;;  %v2042_v56 = vld [vmem:[#allocation12 + $0x5c0] sm:$0xff]  ;;  %v4261_v60 = vcombine.high %v1914_v54, %v1918_v55 }
 0x458   : > { %1784 = vmatpush1.bf16.msra.mxu1 %v1737_v61  ;;  %1815 = vmatprep.mubr.bf16.mxu1 %v5062_v36  ;;  %v4340_v36 = vcombine.low %v1994_v2, %v1998_v3  ;;  %v4389_v61 = vcombine.high %v2042_v56, %v2046_v57  ;;  %v4388_v2 = vcombine.low %v2042_v56, %v2046_v57  ;;  %v2098_v54 = vld [vmem:[#allocation12 + $0x780] sm:$0xff] }
 0x459   : > { %3477 = vmatprep.subr.bf16.mxu1 %v4333_v62  ;;  %v1922_v62 = vld [vmem:[#allocation12 + $0x200] sm:$0xff] }
 0x45a   : > { %v2102_v56 = vld [vmem:[#allocation12 + $0x7a0] sm:$0xff] }
 0x495   : > { %v1247_v0 = vpop.permute.xlu0 %1246 }
 0x496   : > { %vm1248_vm5 = vcmp.eq.s32.totalorder %v1247_v0, %v1244_v39  ;;  %v1926_v39 = vld [vmem:[#allocation12 + $0x220] sm:$0xff] }
 0x497   : > { %v1249_v6 = vsel %vm1248_vm5, 1.0, %v5063_v5  ;;  %v2054_v0 = vld [vmem:[#allocation12 + $0x620] sm:$0xff]  ;;  %v4269_v3 = vcombine.high %v1922_v62, %v1926_v39  ;;  %v4268_v10 = vcombine.low %v1922_v62, %v1926_v39 }
 0x498   : > { %v1250_v7 = vpack.c.bf16 %v1249_v6, %v1249_v6  ;;  %v4397_v5 = vcombine.high %v2050_v63, %v2054_v0  ;;  %v1930_v6 = vld [vmem:[#allocation12 + $0x240] sm:$0xff]  ;;  %v4396_v11 = vcombine.low %v2050_v63, %v2054_v0 }
 0x499   : > { %v2106_v62 = vld [vmem:[#allocation12 + $0x7c0] sm:$0xff] }
 0x49a   : > { %4201 = vmatmul.mubr.msk.bf16.vlgmr.msra.gmra.mrb[4].mxu0 %vm477_vm2, %v1250_v7  ;;  %4203 = vmatmul.mubr.msk.bf16.vlgmr.msra.gmra.mrb[4].mxu1 %vm477_vm2, %v1250_v7  ;;  %v1934_v7 = vld [vmem:[#allocation12 + $0x260] sm:$0xff] }
 0x49b   : > { %3437 = vmatpush1.bf16.msra.mxu0 %v4204_v26  ;;  %3478 = vmatpush1.bf16.msra.mxu1 %v4332_v29  ;;  %v2018_v26 = vld [vmem:[#allocation12 + $0x500] sm:$0xff]  ;;  %v4356_v29 = vcombine.low %v2010_v18, %v2014_v19  ;;  %v4277_v12 = vcombine.high %v1930_v6, %v1934_v7  ;;  %v4276_v16 = vcombine.low %v1930_v6, %v1934_v7  ;;  %v5404_v6 = vld [vmem:[#allocation12 + $0x408] sm:$0xff] }
 0x49c   : > { %3438 = vmatprep.subr.bf16.mxu0 %v4213_v8  ;;  %3479 = vmatprep.subr.bf16.mxu1 %v4341_v9  ;;  %v4365_v34 = vcombine.high %v2018_v26, %v2022_v27  ;;  %v4364_v44 = vcombine.low %v2018_v26, %v2022_v27  ;;  %v2058_v8 = vld [vmem:[#allocation12 + $0x640] sm:$0xff] }
 0x49d   : > { %v2062_v9 = vld [vmem:[#allocation12 + $0x660] sm:$0xff] }
 0x49e   : > { %v4405_v13 = vcombine.high %v2058_v8, %v2062_v9  ;;  %v4404_v17 = vcombine.low %v2058_v8, %v2062_v9  ;;  %v2110_v63 = vld [vmem:[#allocation12 + $0x7e0] sm:$0xff]  ;;  %v1991_v8 = vld [vmem:[#allocation12 + $0x428] sm:$0xff] }
 0x49f   : > { %3439 = vmatpush1.bf16.msra.mxu0 %v4212_v31  ;;  %3480 = vmatpush1.bf16.msra.mxu1 %v4340_v36  ;;  %v1938_v31 = vld [vmem:[#allocation12 + $0x280] sm:$0xff] }
 0x4a0   : > { %3440 = vmatprep.subr.bf16.mxu0 %v4221_v14  ;;  %3481 = vmatprep.subr.bf16.mxu1 %v4349_v15  ;;  %v1942_v36 = vld [vmem:[#allocation12 + $0x2a0] sm:$0xff] }
 0x4a1   : > { %v2066_v14 = vld [vmem:[#allocation12 + $0x680] sm:$0xff]  ;;  %v4285_v18 = vcombine.high %v1938_v31, %v1942_v36  ;;  %v4284_v24 = vcombine.low %v1938_v31, %v1942_v36 }
 0x4a2   : > { %v2070_v15 = vld [vmem:[#allocation12 + $0x6a0] sm:$0xff] }
 0x4a3   : > { %3441 = vmatpush1.bf16.msra.mxu0 %v4220_v20  ;;  %3482 = vmatpush1.bf16.msra.mxu1 %v4348_v21  ;;  %v4413_v19 = vcombine.high %v2066_v14, %v2070_v15  ;;  %v1946_v20 = vld [vmem:[#allocation12 + $0x2c0] sm:$0xff]  ;;  %v4412_v25 = vcombine.low %v2066_v14, %v2070_v15 }
 0x4a4   : > { %3442 = vmatprep.subr.bf16.mxu0 %v4229_v22  ;;  %3483 = vmatprep.subr.bf16.mxu1 %v4357_v23  ;;  %v1950_v21 = vld [vmem:[#allocation12 + $0x2e0] sm:$0xff] }
 0x4a5   : > { %v2074_v22 = vld [vmem:[#allocation12 + $0x6c0] sm:$0xff]  ;;  %v4293_v26 = vcombine.high %v1946_v20, %v1950_v21  ;;  %v4292_v37 = vcombine.low %v1946_v20, %v1950_v21  ;;  %v1840_v20 = vsub.s32 3, %v5318_v32 }
 0x4a6   : > { %v2078_v23 = vld [vmem:[#allocation12 + $0x6e0] sm:$0xff] }
 0x4a7   : > { %3443 = vmatpush1.bf16.msra.mxu0 %v4228_v28  ;;  %3484 = vmatpush1.bf16.msra.mxu1 %v4356_v29  ;;  %v4421_v27 = vcombine.high %v2074_v22, %v2078_v23  ;;  %v1954_v28 = vld [vmem:[#allocation12 + $0x300] sm:$0xff]  ;;  %v4420_v38 = vcombine.low %v2074_v22, %v2078_v23 }
 0x4a8   : > { %3444 = vmatprep.subr.bf16.mxu0 %v4237_v30  ;;  %3485 = vmatprep.subr.bf16.mxu1 %v4365_v34  ;;  %v1958_v29 = vld [vmem:[#allocation12 + $0x320] sm:$0xff] }
 0x4a9   : > { %v2082_v30 = vld [vmem:[#allocation12 + $0x700] sm:$0xff]  ;;  %v4301_v40 = vcombine.high %v1954_v28, %v1958_v29  ;;  %v4300_v46 = vcombine.low %v1954_v28, %v1958_v29 }
 0x4aa   : > { %v2086_v34 = vld [vmem:[#allocation12 + $0x720] sm:$0xff] }
 0x4ab   : > { %3445 = vmatpush1.bf16.msra.mxu0 %v4236_v43  ;;  %3486 = vmatpush1.bf16.msra.mxu1 %v4364_v44  ;;  %v4429_v42 = vcombine.high %v2082_v30, %v2086_v34  ;;  %v1962_v43 = vld [vmem:[#allocation12 + $0x340] sm:$0xff]  ;;  %v4428_v47 = vcombine.low %v2082_v30, %v2086_v34 }
 0x4ac   : > { %3446 = vmatprep.subr.bf16.mxu0 %v4245_v45  ;;  %3487 = vmatprep.subr.bf16.mxu1 %v4373_v41  ;;  %v1966_v44 = vld [vmem:[#allocation12 + $0x360] sm:$0xff] }
 0x4ad   : > { %v2090_v45 = vld [vmem:[#allocation12 + $0x740] sm:$0xff]  ;;  %v4309_v48 = vcombine.high %v1962_v43, %v1966_v44 }
 0x4ae   : > { %v2094_v41 = vld [vmem:[#allocation12 + $0x760] sm:$0xff] }
 0x4af   : > { %3447 = vmatpush1.bf16.msra.mxu0 %v4244_v50  ;;  %3488 = vmatpush1.bf16.msra.mxu1 %v4372_v51  ;;  %v4437_v49 = vcombine.high %v2090_v45, %v2094_v41  ;;  %v4308_v50 = vcombine.low %v1962_v43, %v1966_v44  ;;  %v4436_v51 = vcombine.low %v2090_v45, %v2094_v41 }
 0x4b0   : > { %3448 = vmatprep.subr.bf16.mxu0 %v4253_v52  ;;  %3489 = vmatprep.subr.bf16.mxu1 %v4381_v53  ;;  %v1970_v52 = vld [vmem:[#allocation12 + $0x380] sm:$0xff] }
 0x4b1   : > { %v1974_v53 = vld [vmem:[#allocation12 + $0x3a0] sm:$0xff] }
 0x4b2   : > { %v4317_v55 = vcombine.high %v1970_v52, %v1974_v53  ;;  %v4316_v57 = vcombine.low %v1970_v52, %v1974_v53  ;;  %v1871_v52 = vld [vmem:[#allocation12 + $0x68] sm:$0xff] }
 0x4b3   : > { %3449 = vmatpush1.bf16.msra.mxu0 %v4252_v58  ;;  %3490 = vmatpush1.bf16.msra.mxu1 %v4380_v59  ;;  %v4444_v58 = vcombine.low %v2098_v54, %v2102_v56  ;;  %v4445_v59 = vcombine.high %v2098_v54, %v2102_v56  ;;  %v1995_v53 = vld [vmem:[#allocation12 + $0x448] sm:$0xff] }
 0x4b4   : > { %3450 = vmatprep.subr.bf16.mxu0 %v4261_v60  ;;  %3491 = vmatprep.subr.bf16.mxu1 %v4389_v61  ;;  %v1978_v60 = vld [vmem:[#allocation12 + $0x3c0] sm:$0xff]  ;;  %v1999_v54 = vld [vmem:[#allocation12 + $0x468] sm:$0xff] }
 0x4b5   : > { %v1982_v61 = vld [vmem:[#allocation12 + $0x3e0] sm:$0xff] }
 0x4b6   : > { %v4325_v39 = vcombine.high %v1978_v60, %v1982_v61  ;;  %v4324_v0 = vcombine.low %v1978_v60, %v1982_v61  ;;  %v4343_v61 = vcombine.high %v1995_v53, %v1999_v54 }
 0x4b7   : > { %3451 = vmatpush1.bf16.msra.mxu0 %v4260_v1  ;;  %3492 = vmatpush1.bf16.msra.mxu1 %v4388_v2  ;;  %v4452_v1 = vcombine.low %v2106_v62, %v2110_v63  ;;  %v4453_v2 = vcombine.high %v2106_v62, %v2110_v63  ;;  %v1879_v62 = vld [vmem:[#allocation12 + $0xa8] sm:$0xff] }
 0x4b8   : > { %3452 = vmatprep.subr.bf16.mxu0 %v4269_v3  ;;  %3493 = vmatprep.subr.bf16.mxu1 %v4397_v5  ;;  %v5400_v3 = vld [vmem:[#allocation12 + $0x8] sm:$0xff] }
 0x4b9   : > { %v5402_v5 = vld [vmem:[#allocation12 + $0x28] sm:$0xff] }
 0x4ba   : > { %v4207_v7 = vcombine.high %v5400_v3, %v5402_v5  ;;  %v4206_v9 = vcombine.low %v5400_v3, %v5402_v5  ;;  %v2007_v63 = vld [vmem:[#allocation12 + $0x4a8] sm:$0xff] }
 0x4bb   : > { %3453 = vmatpush1.bf16.msra.mxu0 %v4268_v10  ;;  %3494 = vmatpush1.bf16.msra.mxu1 %v4396_v11  ;;  %v4334_v10 = vcombine.low %v5404_v6, %v1991_v8  ;;  %v4335_v11 = vcombine.high %v5404_v6, %v1991_v8  ;;  %v1883_v5 = vld [vmem:[#allocation12 + $0xc8] sm:$0xff] }
 0x4bc   : > { %3454 = vmatprep.subr.bf16.mxu0 %v4277_v12  ;;  %3495 = vmatprep.subr.bf16.mxu1 %v4405_v13  ;;  %v1887_v6 = vld [vmem:[#allocation12 + $0xe8] sm:$0xff] }
 0x4bd   : > { %v2015_v8 = vld [vmem:[#allocation12 + $0x4e8] sm:$0xff] }
 0x4bf   : > { %3455 = vmatpush1.bf16.msra.mxu0 %v4276_v16  ;;  %3496 = vmatpush1.bf16.msra.mxu1 %v4404_v17 }
 0x4c0   : > { %3456 = vmatprep.subr.bf16.mxu0 %v4285_v18  ;;  %3497 = vmatprep.subr.bf16.mxu1 %v4413_v19  ;;  %v1836_v18 = vsub.s32 2, %v5318_v32  ;;  %v1824_v19 = vld [vmem:[%s5594_s21] sm:$0xf] }
 0x4c1   : > { %v1829_v21 = vrot.slane %v1824_v19, %v5321_v33 }
 0x4c2   : > { %v1837_v22 = vrot.slane %v1824_v19, %v1836_v18 }
 0x4c3   : > { %3457 = vmatpush1.bf16.msra.mxu0 %v4284_v24  ;;  %3498 = vmatpush1.bf16.msra.mxu1 %v4412_v25  ;;  %v1833_v25 = vrot.slane %v1824_v19, %v5327_v35 }
 0x4c4   : > { %3458 = vmatprep.subr.bf16.mxu0 %v4293_v26  ;;  %3499 = vmatprep.subr.bf16.mxu1 %v4421_v27  ;;  %v1841_v26 = vrot.slane %v1824_v19, %v1840_v20 }
 0x4c7   : > { %3459 = vmatpush1.bf16.msra.mxu0 %v4292_v37  ;;  %3500 = vmatpush1.bf16.msra.mxu1 %v4420_v38 }
 0x4c8   : > { %3460 = vmatprep.subr.bf16.mxu0 %v4301_v40  ;;  %3501 = vmatprep.subr.bf16.mxu1 %v4429_v42 }
 0x4cb   : > { %3461 = vmatpush1.bf16.msra.mxu0 %v4300_v46  ;;  %3502 = vmatpush1.bf16.msra.mxu1 %v4428_v47 }
 0x4cc   : > { %3462 = vmatprep.subr.bf16.mxu0 %v4309_v48  ;;  %3503 = vmatprep.subr.bf16.mxu1 %v4437_v49 }
 0x4cf   : > { %3463 = vmatpush1.bf16.msra.mxu0 %v4308_v50  ;;  %3504 = vmatpush1.bf16.msra.mxu1 %v4436_v51  ;;  %v1867_v51 = vld [vmem:[#allocation12 + $0x48] sm:$0xff] }
 0x4d0   : > { %3464 = vmatprep.subr.bf16.mxu0 %v4317_v55  ;;  %3505 = vmatprep.subr.bf16.mxu1 %v4445_v59  ;;  %v1875_v59 = vld [vmem:[#allocation12 + $0x88] sm:$0xff]  ;;  %v4215_v60 = vcombine.high %v1867_v51, %v1871_v52 }
 0x4d3   : > { %3465 = vmatpush1.bf16.msra.mxu0 %v4316_v57  ;;  %3506 = vmatpush1.bf16.msra.mxu1 %v4444_v58 }
 0x4d4   : > { %3466 = vmatprep.subr.bf16.mxu0 %v4325_v39  ;;  %3507 = vmatprep.subr.bf16.mxu1 %v4453_v2  ;;  %v2003_v39 = vld [vmem:[#allocation12 + $0x488] sm:$0xff]  ;;  %v4223_v2 = vcombine.high %v1875_v59, %v1879_v62 }
 0x4d5   : > { %v4351_v3 = vcombine.high %v2003_v39, %v2007_v63 }
 0x4d7   : > { %3467 = vmatpush1.bf16.msra.mxu0 %v4324_v0  ;;  %3508 = vmatpush1.bf16.msra.mxu1 %v4452_v1  ;;  %v4214_v0 = vcombine.low %v1867_v51, %v1871_v52  ;;  %v4342_v1 = vcombine.low %v1995_v53, %v1999_v54  ;;  %v1923_v51 = vld [vmem:[#allocation12 + $0x208] sm:$0xff] }
 0x4d8   : > { %3518 = vmatprep.subr.bf16.mxu0 %v4207_v7  ;;  %3559 = vmatprep.subr.bf16.mxu1 %v4335_v11  ;;  %v2011_v7 = vld [vmem:[#allocation12 + $0x4c8] sm:$0xff]  ;;  %v4222_v11 = vcombine.low %v1875_v59, %v1879_v62 }
 0x4d9   : > { %v1927_v52 = vld [vmem:[#allocation12 + $0x228] sm:$0xff] }
 0x4da   : > { %v2051_v53 = vld [vmem:[#allocation12 + $0x608] sm:$0xff] }
 0x4db   : > { %v2055_v54 = vld [vmem:[#allocation12 + $0x628] sm:$0xff] }
 0x4dc   : > { %v4399_v62 = vcombine.high %v2051_v53, %v2055_v54 }
 0x528   : > { %v1679_v12 = vpop.f32.mrb[0].mxu0 }
 0x529   : > { %v1681_v13 = vpop.f32.mrb[1].mxu0 }
 0x52a   : > { %v1720_v31 = vpop.f32.mrb[0].mxu1  ;;  %v1683_v36 = vpop.f32.mrb[2].mxu0 }
 0x52b   : > { %v1722_v14 = vpop.f32.mrb[1].mxu1  ;;  %v1684_v15 = vpop.f32.mrb[3].mxu0  ;;  %v2019_v36 = vld [vmem:[#allocation12 + $0x508] sm:$0xff] }
 0x52c   : > { %v1724_v16 = vpop.f32.mrb[2].mxu1  ;;  %v4230_v15 = vcombine.low %v1883_v5, %v1887_v6 }
 0x52d   : > { %v1725_v17 = vpop.f32.mrb[3].mxu1  ;;  %v4358_v16 = vcombine.low %v2011_v7, %v2015_v8 }
 0x56d   : > { %v1776_v23 = vpop.f32.mrb[4].mxu0  ;;  %v1817_v24 = vpop.f32.mrb[4].mxu1 }
 0x56e   : > { %v1777_v27 = vadd.f32 %v1776_v23, %v1679_v12  ;;  %v1818_v28 = vadd.f32 %v1817_v24, %v1720_v31  ;;  %v1778_v29 = vpop.f32.mrb[5].mxu0  ;;  %v1819_v30 = vpop.f32.mrb[5].mxu1  ;;  %v4350_v12 = vcombine.low %v2003_v39, %v2007_v63  ;;  %v1895_v31 = vld [vmem:[#allocation12 + $0x128] sm:$0xff] }
 0x56f   : > { %v1779_v34 = vadd.f32 %v1778_v29, %v1681_v13  ;;  %v1820_v37 = vadd.f32 %v1819_v30, %v1722_v14  ;;  %v1780_v38 = vpop.f32.mrb[6].mxu0  ;;  %v1821_v40 = vpop.f32.mrb[6].mxu1  ;;  %v1891_v13 = vld [vmem:[#allocation12 + $0x108] sm:$0xff] }
 0x570   : > { %v1846_v42 = vadd.f32 %v1829_v21, %v1777_v27  ;;  %v1848_v43 = vadd.f32 %v1837_v22, %v1818_v28  ;;  %v1781_v44 = vpop.f32.mrb[7].mxu0  ;;  %v1822_v45 = vpop.f32.mrb[7].mxu1  ;;  %v2023_v14 = vld [vmem:[#allocation12 + $0x528] sm:$0xff]  ;;  %v4239_v17 = vcombine.high %v1891_v13, %v1895_v31 }
 0x571   : > { %v1847_v41 = vadd.f32 %v1833_v25, %v1779_v34  ;;  %v1849_v46 = vadd.f32 %v1841_v26, %v1820_v37  ;;  %v4367_v19 = vcombine.high %v2019_v36, %v2023_v14  ;;  %v1899_v21 = vld [vmem:[#allocation12 + $0x148] sm:$0xff]  ;;  %v4238_v25 = vcombine.low %v1891_v13, %v1895_v31 }
 0x572   : > { %v1850_v47 = vmax.f32 %v1846_v42, 0.0  ;;  %v1852_v48 = vmax.f32 %v1848_v43, 0.0  ;;  %v1903_v22 = vld [vmem:[#allocation12 + $0x168] sm:$0xff]  ;;  %v4366_v26 = vcombine.low %v2019_v36, %v2023_v14 }
 0x573   : > { %v1851_v49 = vmax.f32 %v1847_v41, 0.0  ;;  %v1853_v50 = vmax.f32 %v1849_v46, 0.0  ;;  %v2027_v23 = vld [vmem:[#allocation12 + $0x548] sm:$0xff]  ;;  %v4247_v27 = vcombine.high %v1899_v21, %v1903_v22  ;;  %v4246_v38 = vcombine.low %v1899_v21, %v1903_v22 }
 0x574   : > { %v5427_v57 = vpack.c.bf16 %v1850_v47, %v1850_v47  ;;  %v5429_v58 = vpack.c.bf16 %v1852_v48, %v1852_v48  ;;  %v2031_v24 = vld [vmem:[#allocation12 + $0x568] sm:$0xff] }
 0x575   : > { %v5423_v55 = vpack.c.bf16 %v1851_v49, %v1851_v49  ;;  %v5425_v56 = vpack.c.bf16 %v1853_v50, %v1853_v50  ;;  %v4375_v28 = vcombine.high %v2027_v23, %v2031_v24  ;;  %v1907_v29 = vld [vmem:[#allocation12 + $0x188] sm:$0xff]  ;;  %v4374_v40 = vcombine.low %v2027_v23, %v2031_v24 }
 0x576   : > { %v1911_v30 = vld [vmem:[#allocation12 + $0x1a8] sm:$0xff] }
 0x577   : > { %3468 = vmatprep.mubr.bf16.mxu0 %v5423_v55  ;;  %3509 = vmatprep.mubr.bf16.mxu1 %v5425_v56  ;;  %v2035_v34 = vld [vmem:[#allocation12 + $0x588] sm:$0xff]  ;;  %v4255_v42 = vcombine.high %v1907_v29, %v1911_v30  ;;  %v4254_v47 = vcombine.low %v1907_v29, %v1911_v30 }
 0x578   : > { %3469 = vmatmul.mubr.bf16.vlgmr.msra.gmra.mrb[8].mxu0 %v5427_v57  ;;  %3510 = vmatmul.mubr.bf16.vlgmr.msra.gmra.mrb[8].mxu1 %v5429_v58  ;;  %v2039_v37 = vld [vmem:[#allocation12 + $0x5a8] sm:$0xff] }
 0x579   : > { %3519 = vmatpush1.bf16.msra.mxu0 %v4206_v9  ;;  %3560 = vmatpush1.bf16.msra.mxu1 %v4334_v10  ;;  %v4231_v9 = vcombine.high %v1883_v5, %v1887_v6  ;;  %v4359_v10 = vcombine.high %v2011_v7, %v2015_v8  ;;  %v4383_v43 = vcombine.high %v2035_v34, %v2039_v37  ;;  %v1915_v44 = vld [vmem:[#allocation12 + $0x1c8] sm:$0xff] }
 0x57a   : > { %3550 = vmatprep.mubr.bf16.mxu0 %v5423_v55  ;;  %3591 = vmatprep.mubr.bf16.mxu1 %v5425_v56  ;;  %v1919_v45 = vld [vmem:[#allocation12 + $0x1e8] sm:$0xff]  ;;  %v4382_v48 = vcombine.low %v2035_v34, %v2039_v37 }
 0x57b   : > { %3520 = vmatprep.subr.bf16.mxu0 %v4215_v60  ;;  %3561 = vmatprep.subr.bf16.mxu1 %v4343_v61  ;;  %v2043_v41 = vld [vmem:[#allocation12 + $0x5c8] sm:$0xff]  ;;  %v4263_v49 = vcombine.high %v1915_v44, %v1919_v45  ;;  %v4262_v59 = vcombine.low %v1915_v44, %v1919_v45  ;;  %v4271_v61 = vcombine.high %v1923_v51, %v1927_v52 }
 0x57c   : > { %v2047_v46 = vld [vmem:[#allocation12 + $0x5e8] sm:$0xff] }
 0x57d   : > { %3521 = vmatpush1.bf16.msra.mxu0 %v4214_v0  ;;  %3562 = vmatpush1.bf16.msra.mxu1 %v4342_v1  ;;  %v4391_v50 = vcombine.high %v2043_v41, %v2047_v46  ;;  %v4390_v60 = vcombine.low %v2043_v41, %v2047_v46  ;;  %v1931_v39 = vld [vmem:[#allocation12 + $0x248] sm:$0xff] }
 0x57e   : > { %3522 = vmatprep.subr.bf16.mxu0 %v4223_v2  ;;  %3563 = vmatprep.subr.bf16.mxu1 %v4351_v3  ;;  %v1935_v63 = vld [vmem:[#allocation12 + $0x268] sm:$0xff]  ;;  %v4270_v2 = vcombine.low %v1923_v51, %v1927_v52  ;;  %v4398_v3 = vcombine.low %v2051_v53, %v2055_v54 }
 0x57f   : > { %v2059_v0 = vld [vmem:[#allocation12 + $0x648] sm:$0xff]  ;;  %v4279_v5 = vcombine.high %v1931_v39, %v1935_v63 }
 0x580   : > { %v2063_v1 = vld [vmem:[#allocation12 + $0x668] sm:$0xff] }
 0x581   : > { %3523 = vmatpush1.bf16.msra.mxu0 %v4222_v11  ;;  %3564 = vmatpush1.bf16.msra.mxu1 %v4350_v12  ;;  %v4407_v6 = vcombine.high %v2059_v0, %v2063_v1  ;;  %v1939_v7 = vld [vmem:[#allocation12 + $0x288] sm:$0xff] }
 0x582   : > { %3524 = vmatprep.subr.bf16.mxu0 %v4231_v9  ;;  %3565 = vmatprep.subr.bf16.mxu1 %v4359_v10  ;;  %v1943_v8 = vld [vmem:[#allocation12 + $0x2a8] sm:$0xff]  ;;  %v4278_v9 = vcombine.low %v1931_v39, %v1935_v63  ;;  %v4406_v10 = vcombine.low %v2059_v0, %v2063_v1  ;;  %v1860_v0 = vld [vmem:[#allocation12 + $0x10] sm:$0xff] }
 0x583   : > { %v2067_v11 = vld [vmem:[#allocation12 + $0x688] sm:$0xff]  ;;  %v4287_v13 = vcombine.high %v1939_v7, %v1943_v8  ;;  %v1864_v1 = vld [vmem:[#allocation12 + $0x30] sm:$0xff] }
 0x584   : > { %v2071_v12 = vld [vmem:[#allocation12 + $0x6a8] sm:$0xff] }
 0x585   : > { %3525 = vmatpush1.bf16.msra.mxu0 %v4230_v15  ;;  %3566 = vmatpush1.bf16.msra.mxu1 %v4358_v16  ;;  %v4415_v31 = vcombine.high %v2067_v11, %v2071_v12  ;;  %v1947_v36 = vld [vmem:[#allocation12 + $0x2c8] sm:$0xff] }
 0x586   : > { %3526 = vmatprep.subr.bf16.mxu0 %v4239_v17  ;;  %3567 = vmatprep.subr.bf16.mxu1 %v4367_v19  ;;  %v1951_v14 = vld [vmem:[#allocation12 + $0x2e8] sm:$0xff]  ;;  %v4286_v17 = vcombine.low %v1939_v7, %v1943_v8  ;;  %v4414_v19 = vcombine.low %v2067_v11, %v2071_v12  ;;  %v4209_v7 = vcombine.high %v1860_v0, %v1864_v1  ;;  %v1868_v11 = vld [vmem:[#allocation12 + $0x50] sm:$0xff] }
 0x587   : > { %v2075_v15 = vld [vmem:[#allocation12 + $0x6c8] sm:$0xff]  ;;  %v4295_v21 = vcombine.high %v1947_v36, %v1951_v14  ;;  %v1872_v12 = vld [vmem:[#allocation12 + $0x70] sm:$0xff] }
 0x588   : > { %v2079_v16 = vld [vmem:[#allocation12 + $0x6e8] sm:$0xff] }
 0x589   : > { %3527 = vmatpush1.bf16.msra.mxu0 %v4238_v25  ;;  %3568 = vmatpush1.bf16.msra.mxu1 %v4366_v26  ;;  %v4423_v22 = vcombine.high %v2075_v15, %v2079_v16  ;;  %v1955_v23 = vld [vmem:[#allocation12 + $0x308] sm:$0xff] }
 0x58a   : > { %3528 = vmatprep.subr.bf16.mxu0 %v4247_v27  ;;  %3569 = vmatprep.subr.bf16.mxu1 %v4375_v28  ;;  %v1959_v24 = vld [vmem:[#allocation12 + $0x328] sm:$0xff]  ;;  %v4294_v27 = vcombine.low %v1947_v36, %v1951_v14  ;;  %v4422_v28 = vcombine.low %v2075_v15, %v2079_v16  ;;  %v4217_v36 = vcombine.high %v1868_v11, %v1872_v12  ;;  %v1876_v15 = vld [vmem:[#allocation12 + $0x90] sm:$0xff] }
 0x58b   : > { %v2083_v25 = vld [vmem:[#allocation12 + $0x708] sm:$0xff]  ;;  %v4303_v29 = vcombine.high %v1955_v23, %v1959_v24  ;;  %v1880_v16 = vld [vmem:[#allocation12 + $0xb0] sm:$0xff] }
 0x58c   : > { %v2087_v26 = vld [vmem:[#allocation12 + $0x728] sm:$0xff] }
 0x58d   : > { %3529 = vmatpush1.bf16.msra.mxu0 %v4246_v38  ;;  %3570 = vmatpush1.bf16.msra.mxu1 %v4374_v40  ;;  %v4431_v30 = vcombine.high %v2083_v25, %v2087_v26  ;;  %v1963_v34 = vld [vmem:[#allocation12 + $0x348] sm:$0xff] }
 0x58e   : > { %3530 = vmatprep.subr.bf16.mxu0 %v4255_v42  ;;  %3571 = vmatprep.subr.bf16.mxu1 %v4383_v43  ;;  %v1967_v37 = vld [vmem:[#allocation12 + $0x368] sm:$0xff]  ;;  %v4302_v42 = vcombine.low %v1955_v23, %v1959_v24  ;;  %v4430_v43 = vcombine.low %v2083_v25, %v2087_v26  ;;  %v4225_v23 = vcombine.high %v1876_v15, %v1880_v16  ;;  %v1884_v25 = vld [vmem:[#allocation12 + $0xd0] sm:$0xff] }
 0x58f   : > { %v2091_v38 = vld [vmem:[#allocation12 + $0x748] sm:$0xff]  ;;  %v4311_v44 = vcombine.high %v1963_v34, %v1967_v37  ;;  %v1888_v26 = vld [vmem:[#allocation12 + $0xf0] sm:$0xff] }
 0x590   : > { %v2095_v40 = vld [vmem:[#allocation12 + $0x768] sm:$0xff] }
 0x591   : > { %3531 = vmatpush1.bf16.msra.mxu0 %v4254_v47  ;;  %3572 = vmatpush1.bf16.msra.mxu1 %v4382_v48  ;;  %v4439_v45 = vcombine.high %v2091_v38, %v2095_v40  ;;  %v1971_v41 = vld [vmem:[#allocation12 + $0x388] sm:$0xff] }
 0x592   : > { %3532 = vmatprep.subr.bf16.mxu0 %v4263_v49  ;;  %3573 = vmatprep.subr.bf16.mxu1 %v4391_v50  ;;  %v1975_v46 = vld [vmem:[#allocation12 + $0x3a8] sm:$0xff]  ;;  %v4310_v49 = vcombine.low %v1963_v34, %v1967_v37  ;;  %v4438_v50 = vcombine.low %v2091_v38, %v2095_v40  ;;  %v4233_v34 = vcombine.high %v1884_v25, %v1888_v26  ;;  %v1892_v38 = vld [vmem:[#allocation12 + $0x110] sm:$0xff] }
 0x593   : > { %v2099_v47 = vld [vmem:[#allocation12 + $0x788] sm:$0xff]  ;;  %v4319_v51 = vcombine.high %v1971_v41, %v1975_v46  ;;  %v1896_v40 = vld [vmem:[#allocation12 + $0x130] sm:$0xff] }
 0x594   : > { %v2103_v48 = vld [vmem:[#allocation12 + $0x7a8] sm:$0xff] }
 0x595   : > { %3533 = vmatpush1.bf16.msra.mxu0 %v4262_v59  ;;  %3574 = vmatpush1.bf16.msra.mxu1 %v4390_v60  ;;  %v4447_v52 = vcombine.high %v2099_v47, %v2103_v48  ;;  %v1979_v53 = vld [vmem:[#allocation12 + $0x3c8] sm:$0xff] }
 0x596   : > { %3534 = vmatprep.subr.bf16.mxu0 %v4271_v61  ;;  %3575 = vmatprep.subr.bf16.mxu1 %v4399_v62  ;;  %v1983_v54 = vld [vmem:[#allocation12 + $0x3e8] sm:$0xff]  ;;  %v4318_v61 = vcombine.low %v1971_v41, %v1975_v46  ;;  %v4446_v62 = vcombine.low %v2099_v47, %v2103_v48  ;;  %v4241_v41 = vcombine.high %v1892_v38, %v1896_v40  ;;  %v1900_v47 = vld [vmem:[#allocation12 + $0x150] sm:$0xff] }
 0x597   : > { %v2107_v59 = vld [vmem:[#allocation12 + $0x7c8] sm:$0xff]  ;;  %v4327_v39 = vcombine.high %v1979_v53, %v1983_v54  ;;  %v1904_v48 = vld [vmem:[#allocation12 + $0x170] sm:$0xff] }
 0x598   : > { %v2111_v60 = vld [vmem:[#allocation12 + $0x7e8] sm:$0xff] }
 0x599   : > { %3535 = vmatpush1.bf16.msra.mxu0 %v4270_v2  ;;  %3576 = vmatpush1.bf16.msra.mxu1 %v4398_v3  ;;  %v4455_v63 = vcombine.high %v2107_v59, %v2111_v60  ;;  %v1988_v2 = vld [vmem:[#allocation12 + $0x410] sm:$0xff] }
 0x59a   : > { %3536 = vmatprep.subr.bf16.mxu0 %v4279_v5  ;;  %3577 = vmatprep.subr.bf16.mxu1 %v4407_v6  ;;  %v1992_v3 = vld [vmem:[#allocation12 + $0x430] sm:$0xff]  ;;  %v4326_v5 = vcombine.low %v1979_v53, %v1983_v54  ;;  %v4454_v6 = vcombine.low %v2107_v59, %v2111_v60  ;;  %v4249_v53 = vcombine.high %v1900_v47, %v1904_v48 }
 0x59b   : > { %v4337_v8 = vcombine.high %v1988_v2, %v1992_v3  ;;  %v1908_v59 = vld [vmem:[#allocation12 + $0x190] sm:$0xff] }
 0x59c   : > { %v1912_v60 = vld [vmem:[#allocation12 + $0x1b0] sm:$0xff] }
 0x59d   : > { %3537 = vmatpush1.bf16.msra.mxu0 %v4278_v9  ;;  %3578 = vmatpush1.bf16.msra.mxu1 %v4406_v10  ;;  %v1996_v9 = vld [vmem:[#allocation12 + $0x450] sm:$0xff] }
 0x59e   : > { %3538 = vmatprep.subr.bf16.mxu0 %v4287_v13  ;;  %3579 = vmatprep.subr.bf16.mxu1 %v4415_v31  ;;  %v2000_v10 = vld [vmem:[#allocation12 + $0x470] sm:$0xff]  ;;  %v4208_v13 = vcombine.low %v1860_v0, %v1864_v1  ;;  %v4336_v31 = vcombine.low %v1988_v2, %v1992_v3  ;;  %v4257_v0 = vcombine.high %v1908_v59, %v1912_v60 }
 0x59f   : > { %v4345_v14 = vcombine.high %v1996_v9, %v2000_v10  ;;  %v1916_v2 = vld [vmem:[#allocation12 + $0x1d0] sm:$0xff] }
 0x5a0   : > { %v1920_v3 = vld [vmem:[#allocation12 + $0x1f0] sm:$0xff] }
 0x5a1   : > { %3539 = vmatpush1.bf16.msra.mxu0 %v4286_v17  ;;  %3580 = vmatpush1.bf16.msra.mxu1 %v4414_v19  ;;  %v2004_v17 = vld [vmem:[#allocation12 + $0x490] sm:$0xff] }
 0x5a2   : > { %3540 = vmatprep.subr.bf16.mxu0 %v4295_v21  ;;  %3581 = vmatprep.subr.bf16.mxu1 %v4423_v22  ;;  %v2008_v19 = vld [vmem:[#allocation12 + $0x4b0] sm:$0xff]  ;;  %v4216_v21 = vcombine.low %v1868_v11, %v1872_v12  ;;  %v4344_v22 = vcombine.low %v1996_v9, %v2000_v10  ;;  %v4265_v11 = vcombine.high %v1916_v2, %v1920_v3 }
 0x5a3   : > { %v4353_v24 = vcombine.high %v2004_v17, %v2008_v19  ;;  %v1924_v9 = vld [vmem:[#allocation12 + $0x210] sm:$0xff] }
 0x5a4   : > { %v1928_v10 = vld [vmem:[#allocation12 + $0x230] sm:$0xff] }
 0x5a5   : > { %3541 = vmatpush1.bf16.msra.mxu0 %v4294_v27  ;;  %3582 = vmatpush1.bf16.msra.mxu1 %v4422_v28  ;;  %v2012_v27 = vld [vmem:[#allocation12 + $0x4d0] sm:$0xff] }
 0x5a6   : > { %3542 = vmatprep.subr.bf16.mxu0 %v4303_v29  ;;  %3583 = vmatprep.subr.bf16.mxu1 %v4431_v30  ;;  %v2016_v28 = vld [vmem:[#allocation12 + $0x4f0] sm:$0xff]  ;;  %v4224_v29 = vcombine.low %v1876_v15, %v1880_v16  ;;  %v4352_v30 = vcombine.low %v2004_v17, %v2008_v19  ;;  %v4273_v15 = vcombine.high %v1924_v9, %v1928_v10 }
 0x5a7   : > { %v4361_v37 = vcombine.high %v2012_v27, %v2016_v28  ;;  %v1932_v17 = vld [vmem:[#allocation12 + $0x250] sm:$0xff] }
 0x5a8   : > { %v1936_v19 = vld [vmem:[#allocation12 + $0x270] sm:$0xff] }
 0x5a9   : > { %3543 = vmatpush1.bf16.msra.mxu0 %v4302_v42  ;;  %3584 = vmatpush1.bf16.msra.mxu1 %v4430_v43  ;;  %v2020_v42 = vld [vmem:[#allocation12 + $0x510] sm:$0xff] }
 0x5aa   : > { %3544 = vmatprep.subr.bf16.mxu0 %v4311_v44  ;;  %3585 = vmatprep.subr.bf16.mxu1 %v4439_v45  ;;  %v2024_v43 = vld [vmem:[#allocation12 + $0x530] sm:$0xff]  ;;  %v4232_v44 = vcombine.low %v1884_v25, %v1888_v26  ;;  %v4360_v45 = vcombine.low %v2012_v27, %v2016_v28  ;;  %v4281_v25 = vcombine.high %v1932_v17, %v1936_v19 }
 0x5ab   : > { %v4369_v46 = vcombine.high %v2020_v42, %v2024_v43  ;;  %v1940_v27 = vld [vmem:[#allocation12 + $0x290] sm:$0xff] }
 0x5ac   : > { %v1944_v28 = vld [vmem:[#allocation12 + $0x2b0] sm:$0xff] }
 0x5ad   : > { %3545 = vmatpush1.bf16.msra.mxu0 %v4310_v49  ;;  %3586 = vmatpush1.bf16.msra.mxu1 %v4438_v50  ;;  %v2028_v49 = vld [vmem:[#allocation12 + $0x550] sm:$0xff] }
 0x5ae   : > { %3546 = vmatprep.subr.bf16.mxu0 %v4319_v51  ;;  %3587 = vmatprep.subr.bf16.mxu1 %v4447_v52  ;;  %v2032_v50 = vld [vmem:[#allocation12 + $0x570] sm:$0xff]  ;;  %v4240_v51 = vcombine.low %v1892_v38, %v1896_v40  ;;  %v4368_v52 = vcombine.low %v2020_v42, %v2024_v43  ;;  %v4289_v38 = vcombine.high %v1940_v27, %v1944_v28 }
 0x5af   : > { %v4377_v54 = vcombine.high %v2028_v49, %v2032_v50  ;;  %v1948_v42 = vld [vmem:[#allocation12 + $0x2d0] sm:$0xff] }
 0x5b0   : > { %v1952_v43 = vld [vmem:[#allocation12 + $0x2f0] sm:$0xff] }
 0x5b1   : > { %3547 = vmatpush1.bf16.msra.mxu0 %v4318_v61  ;;  %3588 = vmatpush1.bf16.msra.mxu1 %v4446_v62  ;;  %v2036_v61 = vld [vmem:[#allocation12 + $0x590] sm:$0xff] }
 0x5b2   : > { %3548 = vmatprep.subr.bf16.mxu0 %v4327_v39  ;;  %3589 = vmatprep.subr.bf16.mxu1 %v4455_v63  ;;  %v2040_v62 = vld [vmem:[#allocation12 + $0x5b0] sm:$0xff]  ;;  %v4248_v39 = vcombine.low %v1900_v47, %v1904_v48  ;;  %v4376_v63 = vcombine.low %v2028_v49, %v2032_v50  ;;  %v4297_v47 = vcombine.high %v1948_v42, %v1952_v43 }
 0x5b3   : > { %v4385_v1 = vcombine.high %v2036_v61, %v2040_v62  ;;  %v1956_v49 = vld [vmem:[#allocation12 + $0x310] sm:$0xff] }
 0x5b4   : > { %v1960_v50 = vld [vmem:[#allocation12 + $0x330] sm:$0xff] }
 0x5b5   : > { %3549 = vmatpush1.bf16.msra.mxu0 %v4326_v5  ;;  %3590 = vmatpush1.bf16.msra.mxu1 %v4454_v6  ;;  %v2044_v5 = vld [vmem:[#allocation12 + $0x5d0] sm:$0xff] }
 0x5b6   : > { %3600 = vmatprep.subr.bf16.mxu0 %v4209_v7  ;;  %3641 = vmatprep.subr.bf16.mxu1 %v4337_v8  ;;  %v2048_v6 = vld [vmem:[#allocation12 + $0x5f0] sm:$0xff]  ;;  %v4256_v7 = vcombine.low %v1908_v59, %v1912_v60  ;;  %v4384_v8 = vcombine.low %v2036_v61, %v2040_v62  ;;  %v4305_v59 = vcombine.high %v1956_v49, %v1960_v50 }
 0x5b7   : > { %v4393_v12 = vcombine.high %v2044_v5, %v2048_v6  ;;  %v1964_v61 = vld [vmem:[#allocation12 + $0x350] sm:$0xff] }
 0x5b8   : > { %3551 = vmatmul.mubr.bf16.vlgmr.msra.gmra.mrb[12].mxu0 %v5427_v57  ;;  %3592 = vmatmul.mubr.bf16.vlgmr.msra.gmra.mrb[12].mxu1 %v5429_v58  ;;  %v1968_v62 = vld [vmem:[#allocation12 + $0x370] sm:$0xff] }
 0x5b9   : > { %3601 = vmatpush1.bf16.msra.mxu0 %v4208_v13  ;;  %3632 = vmatprep.mubr.bf16.mxu0 %v5423_v55  ;;  %v2052_v13 = vld [vmem:[#allocation12 + $0x610] sm:$0xff] }
 0x5ba   : > { %3642 = vmatpush1.bf16.msra.mxu1 %v4336_v31  ;;  %3673 = vmatprep.mubr.bf16.mxu1 %v5425_v56  ;;  %v2056_v31 = vld [vmem:[#allocation12 + $0x630] sm:$0xff] }
 0x5bb   : > { %3602 = vmatprep.subr.bf16.mxu0 %v4217_v36  ;;  %3643 = vmatprep.subr.bf16.mxu1 %v4345_v14  ;;  %v4264_v36 = vcombine.low %v1916_v2, %v1920_v3  ;;  %v4392_v14 = vcombine.low %v2044_v5, %v2048_v6  ;;  %v4401_v16 = vcombine.high %v2052_v13, %v2056_v31  ;;  %v1972_v5 = vld [vmem:[#allocation12 + $0x390] sm:$0xff] }
 0x5bc   : > { %v4313_v2 = vcombine.high %v1964_v61, %v1968_v62  ;;  %v1976_v6 = vld [vmem:[#allocation12 + $0x3b0] sm:$0xff] }
 0x5bd   : > { %3603 = vmatpush1.bf16.msra.mxu0 %v4216_v21  ;;  %v2060_v21 = vld [vmem:[#allocation12 + $0x650] sm:$0xff] }
 0x5be   : > { %3644 = vmatpush1.bf16.msra.mxu1 %v4344_v22  ;;  %3604 = vmatprep.subr.bf16.mxu0 %v4225_v23  ;;  %v2064_v22 = vld [vmem:[#allocation12 + $0x670] sm:$0xff]  ;;  %v4272_v23 = vcombine.low %v1924_v9, %v1928_v10  ;;  %v4321_v9 = vcombine.high %v1972_v5, %v1976_v6 }
 0x5bf   : > { %3645 = vmatprep.subr.bf16.mxu1 %v4353_v24  ;;  %v4400_v24 = vcombine.low %v2052_v13, %v2056_v31  ;;  %v4409_v26 = vcombine.high %v2060_v21, %v2064_v22  ;;  %v1980_v13 = vld [vmem:[#allocation12 + $0x3d0] sm:$0xff] }
 0x5c0   : > { %v1984_v31 = vld [vmem:[#allocation12 + $0x3f0] sm:$0xff] }
 0x5c1   : > { %3605 = vmatpush1.bf16.msra.mxu0 %v4224_v29  ;;  %v2068_v29 = vld [vmem:[#allocation12 + $0x690] sm:$0xff] }
 0x5c2   : > { %3646 = vmatpush1.bf16.msra.mxu1 %v4352_v30  ;;  %3606 = vmatprep.subr.bf16.mxu0 %v4233_v34  ;;  %v2072_v30 = vld [vmem:[#allocation12 + $0x6b0] sm:$0xff]  ;;  %v4280_v34 = vcombine.low %v1932_v17, %v1936_v19  ;;  %v4329_v17 = vcombine.high %v1980_v13, %v1984_v31 }
 0x5c3   : > { %3647 = vmatprep.subr.bf16.mxu1 %v4361_v37  ;;  %v4408_v37 = vcombine.low %v2060_v21, %v2064_v22  ;;  %v4417_v40 = vcombine.high %v2068_v29, %v2072_v30  ;;  %v1861_v21 = vld [vmem:[#allocation12 + $0x18] sm:$0xff] }
 0x5c4   : > { %v1865_v22 = vld [vmem:[#allocation12 + $0x38] sm:$0xff] }
 0x5c5   : > { %3607 = vmatpush1.bf16.msra.mxu0 %v4232_v44  ;;  %v2076_v44 = vld [vmem:[#allocation12 + $0x6d0] sm:$0xff] }
 0x5c6   : > { %3648 = vmatpush1.bf16.msra.mxu1 %v4360_v45  ;;  %3608 = vmatprep.subr.bf16.mxu0 %v4241_v41  ;;  %v2080_v45 = vld [vmem:[#allocation12 + $0x6f0] sm:$0xff]  ;;  %v4288_v41 = vcombine.low %v1940_v27, %v1944_v28  ;;  %v4211_v27 = vcombine.high %v1861_v21, %v1865_v22 }
 0x5c7   : > { %3649 = vmatprep.subr.bf16.mxu1 %v4369_v46  ;;  %v4416_v46 = vcombine.low %v2068_v29, %v2072_v30  ;;  %v4425_v48 = vcombine.high %v2076_v44, %v2080_v45  ;;  %v1869_v29 = vld [vmem:[#allocation12 + $0x58] sm:$0xff] }
 0x5c8   : > { %v1873_v30 = vld [vmem:[#allocation12 + $0x78] sm:$0xff] }
 0x5c9   : > { %3609 = vmatpush1.bf16.msra.mxu0 %v4240_v51  ;;  %v2084_v51 = vld [vmem:[#allocation12 + $0x710] sm:$0xff] }
 0x5ca   : > { %3650 = vmatpush1.bf16.msra.mxu1 %v4368_v52  ;;  %3610 = vmatprep.subr.bf16.mxu0 %v4249_v53  ;;  %v2088_v52 = vld [vmem:[#allocation12 + $0x730] sm:$0xff]  ;;  %v4296_v53 = vcombine.low %v1948_v42, %v1952_v43  ;;  %v4219_v42 = vcombine.high %v1869_v29, %v1873_v30  ;;  %v1877_v43 = vld [vmem:[#allocation12 + $0x98] sm:$0xff] }
 0x5cb   : > { %3651 = vmatprep.subr.bf16.mxu1 %v4377_v54  ;;  %v4424_v54 = vcombine.low %v2076_v44, %v2080_v45  ;;  %v4433_v60 = vcombine.high %v2084_v51, %v2088_v52  ;;  %v1881_v44 = vld [vmem:[#allocation12 + $0xb8] sm:$0xff] }
 0x5cd   : > { %3611 = vmatpush1.bf16.msra.mxu0 %v4248_v39  ;;  %v2092_v39 = vld [vmem:[#allocation12 + $0x750] sm:$0xff] }
 0x5ce   : > { %3652 = vmatpush1.bf16.msra.mxu1 %v4376_v63  ;;  %3612 = vmatprep.subr.bf16.mxu0 %v4257_v0  ;;  %v2096_v63 = vld [vmem:[#allocation12 + $0x770] sm:$0xff]  ;;  %v4304_v0 = vcombine.low %v1956_v49, %v1960_v50  ;;  %v4227_v49 = vcombine.high %v1877_v43, %v1881_v44 }
 0x5cf   : > { %3653 = vmatprep.subr.bf16.mxu1 %v4385_v1  ;;  %v4432_v1 = vcombine.low %v2084_v51, %v2088_v52  ;;  %v4441_v3 = vcombine.high %v2092_v39, %v2096_v63  ;;  %v1885_v51 = vld [vmem:[#allocation12 + $0xd8] sm:$0xff] }
 0x5d0   : > { %v1889_v52 = vld [vmem:[#allocation12 + $0xf8] sm:$0xff] }
 0x5d1   : > { %3613 = vmatpush1.bf16.msra.mxu0 %v4256_v7  ;;  %v2100_v7 = vld [vmem:[#allocation12 + $0x790] sm:$0xff] }
 0x5d2   : > { %3654 = vmatpush1.bf16.msra.mxu1 %v4384_v8  ;;  %3614 = vmatprep.subr.bf16.mxu0 %v4265_v11  ;;  %v2104_v8 = vld [vmem:[#allocation12 + $0x7b0] sm:$0xff]  ;;  %v4312_v11 = vcombine.low %v1964_v61, %v1968_v62  ;;  %v4235_v61 = vcombine.high %v1885_v51, %v1889_v52  ;;  %v1893_v62 = vld [vmem:[#allocation12 + $0x118] sm:$0xff] }
 0x5d3   : > { %3655 = vmatprep.subr.bf16.mxu1 %v4393_v12  ;;  %v4440_v12 = vcombine.low %v2092_v39, %v2096_v63  ;;  %v4449_v10 = vcombine.high %v2100_v7, %v2104_v8  ;;  %v1897_v39 = vld [vmem:[#allocation12 + $0x138] sm:$0xff] }
 0x5d4   : > { %v2021_v63 = vld [vmem:[#allocation12 + $0x518] sm:$0xff] }
 0x5d5   : > { %3615 = vmatpush1.bf16.msra.mxu0 %v4264_v36  ;;  %v2108_v36 = vld [vmem:[#allocation12 + $0x7d0] sm:$0xff] }
 0x5d6   : > { %3656 = vmatpush1.bf16.msra.mxu1 %v4392_v14  ;;  %3616 = vmatprep.subr.bf16.mxu0 %v4273_v15  ;;  %v2112_v14 = vld [vmem:[#allocation12 + $0x7f0] sm:$0xff]  ;;  %v4320_v15 = vcombine.low %v1972_v5, %v1976_v6  ;;  %v1901_v5 = vld [vmem:[#allocation12 + $0x158] sm:$0xff] }
 0x5d7   : > { %3657 = vmatprep.subr.bf16.mxu1 %v4401_v16  ;;  %v4448_v16 = vcombine.low %v2100_v7, %v2104_v8  ;;  %v4457_v19 = vcombine.high %v2108_v36, %v2112_v14  ;;  %v1905_v6 = vld [vmem:[#allocation12 + $0x178] sm:$0xff] }
 0x5d8   : > { %v2029_v7 = vld [vmem:[#allocation12 + $0x558] sm:$0xff] }
 0x5d9   : > { %3617 = vmatpush1.bf16.msra.mxu0 %v4272_v23  ;;  %v1989_v23 = vld [vmem:[#allocation12 + $0x418] sm:$0xff] }
 0x5da   : > { %3658 = vmatpush1.bf16.msra.mxu1 %v4400_v24  ;;  %3618 = vmatprep.subr.bf16.mxu0 %v4281_v25  ;;  %v1993_v24 = vld [vmem:[#allocation12 + $0x438] sm:$0xff]  ;;  %v4328_v25 = vcombine.low %v1980_v13, %v1984_v31 }
 0x5db   : > { %3659 = vmatprep.subr.bf16.mxu1 %v4409_v26  ;;  %v4456_v26 = vcombine.low %v2108_v36, %v2112_v14  ;;  %v4339_v28 = vcombine.high %v1989_v23, %v1993_v24  ;;  %v2033_v8 = vld [vmem:[#allocation12 + $0x578] sm:$0xff] }
 0x5dc   : > { %v1909_v13 = vld [vmem:[#allocation12 + $0x198] sm:$0xff] }
 0x5dd   : > { %3619 = vmatpush1.bf16.msra.mxu0 %v4280_v34  ;;  %v4210_v34 = vcombine.low %v1861_v21, %v1865_v22  ;;  %v1913_v31 = vld [vmem:[#allocation12 + $0x1b8] sm:$0xff] }
 0x5de   : > { %3660 = vmatpush1.bf16.msra.mxu1 %v4408_v37  ;;  %3620 = vmatprep.subr.bf16.mxu0 %v4289_v38  ;;  %v1997_v37 = vld [vmem:[#allocation12 + $0x458] sm:$0xff] }
 0x5df   : > { %3661 = vmatprep.subr.bf16.mxu1 %v4417_v40  ;;  %v2001_v38 = vld [vmem:[#allocation12 + $0x478] sm:$0xff]  ;;  %v4338_v40 = vcombine.low %v1989_v23, %v1993_v24 }
 0x5e0   : > { %v4347_v45 = vcombine.high %v1997_v37, %v2001_v38  ;;  %v2037_v36 = vld [vmem:[#allocation12 + $0x598] sm:$0xff] }
 0x5e1   : > { %3621 = vmatpush1.bf16.msra.mxu0 %v4288_v41  ;;  %v2005_v41 = vld [vmem:[#allocation12 + $0x498] sm:$0xff] }
 0x5e2   : > { %3662 = vmatpush1.bf16.msra.mxu1 %v4416_v46  ;;  %3622 = vmatprep.subr.bf16.mxu0 %v4297_v47  ;;  %v2009_v46 = vld [vmem:[#allocation12 + $0x4b8] sm:$0xff]  ;;  %v4218_v47 = vcombine.low %v1869_v29, %v1873_v30 }
 0x5e3   : > { %3663 = vmatprep.subr.bf16.mxu1 %v4425_v48  ;;  %v4346_v48 = vcombine.low %v1997_v37, %v2001_v38  ;;  %v4355_v50 = vcombine.high %v2005_v41, %v2009_v46  ;;  %v2041_v14 = vld [vmem:[#allocation12 + $0x5b8] sm:$0xff] }
 0x5e4   : > { %v1917_v21 = vld [vmem:[#allocation12 + $0x1d8] sm:$0xff] }
 0x5e5   : > { %3623 = vmatpush1.bf16.msra.mxu0 %v4296_v53  ;;  %v2013_v53 = vld [vmem:[#allocation12 + $0x4d8] sm:$0xff] }
 0x5e6   : > { %3664 = vmatpush1.bf16.msra.mxu1 %v4424_v54  ;;  %3624 = vmatprep.subr.bf16.mxu0 %v4305_v59  ;;  %v2017_v54 = vld [vmem:[#allocation12 + $0x4f8] sm:$0xff]  ;;  %v4226_v59 = vcombine.low %v1877_v43, %v1881_v44 }
 0x5e7   : > { %3665 = vmatprep.subr.bf16.mxu1 %v4433_v60  ;;  %v4354_v60 = vcombine.low %v2005_v41, %v2009_v46  ;;  %v1921_v22 = vld [vmem:[#allocation12 + $0x1f8] sm:$0xff] }
 0x5e8   : > { %v2045_v23 = vld [vmem:[#allocation12 + $0x5d8] sm:$0xff]  ;;  %v4266_v38 = vcombine.low %v1917_v21, %v1921_v22 }
 0x5e9   : > { %3625 = vmatpush1.bf16.msra.mxu0 %v4304_v0  ;;  %v2025_v0 = vld [vmem:[#allocation12 + $0x538] sm:$0xff] }
 0x5ea   : > { %3666 = vmatpush1.bf16.msra.mxu1 %v4432_v1  ;;  %3626 = vmatprep.subr.bf16.mxu0 %v4313_v2  ;;  %v4362_v1 = vcombine.low %v2013_v53, %v2017_v54  ;;  %v4243_v2 = vcombine.high %v1893_v62, %v1897_v39  ;;  %v2049_v24 = vld [vmem:[#allocation12 + $0x5f8] sm:$0xff] }
 0x5eb   : > { %3667 = vmatprep.subr.bf16.mxu1 %v4441_v3  ;;  %v4371_v3 = vcombine.high %v2021_v63, %v2025_v0  ;;  %v1925_v29 = vld [vmem:[#allocation12 + $0x218] sm:$0xff] }
 0x5ec   : > { %v1929_v30 = vld [vmem:[#allocation12 + $0x238] sm:$0xff] }
 0x5ed   : > { %3627 = vmatpush1.bf16.msra.mxu0 %v4312_v11  ;;  %v4242_v11 = vcombine.low %v1893_v62, %v1897_v39  ;;  %v2057_v37 = vld [vmem:[#allocation12 + $0x638] sm:$0xff] }
 0x5ee   : > { %3668 = vmatpush1.bf16.msra.mxu1 %v4440_v12  ;;  %3628 = vmatprep.subr.bf16.mxu0 %v4321_v9  ;;  %v4370_v12 = vcombine.low %v2021_v63, %v2025_v0  ;;  %v4251_v9 = vcombine.high %v1901_v5, %v1905_v6  ;;  %v1933_v44 = vld [vmem:[#allocation12 + $0x258] sm:$0xff] }
 0x5ef   : > { %3669 = vmatprep.subr.bf16.mxu1 %v4449_v10  ;;  %v4379_v10 = vcombine.high %v2029_v7, %v2033_v8  ;;  %v2061_v41 = vld [vmem:[#allocation12 + $0x658] sm:$0xff] }
 0x5f0   : > { %v2065_v46 = vld [vmem:[#allocation12 + $0x678] sm:$0xff] }
 0x5f1   : > { %3629 = vmatpush1.bf16.msra.mxu0 %v4320_v15  ;;  %v4250_v15 = vcombine.low %v1901_v5, %v1905_v6  ;;  %v1949_v62 = vld [vmem:[#allocation12 + $0x2d8] sm:$0xff] }
 0x5f2   : > { %3670 = vmatpush1.bf16.msra.mxu1 %v4448_v16  ;;  %3630 = vmatprep.subr.bf16.mxu0 %v4329_v17  ;;  %v4378_v16 = vcombine.low %v2029_v7, %v2033_v8  ;;  %v4259_v17 = vcombine.high %v1909_v13, %v1913_v31  ;;  %v1953_v39 = vld [vmem:[#allocation12 + $0x2f8] sm:$0xff] }
 0x5f3   : > { %3671 = vmatprep.subr.bf16.mxu1 %v4457_v19  ;;  %v4387_v19 = vcombine.high %v2037_v36, %v2041_v14  ;;  %v2077_v63 = vld [vmem:[#allocation12 + $0x6d8] sm:$0xff] }
 0x5f4   : > { %v2081_v0 = vld [vmem:[#allocation12 + $0x6f8] sm:$0xff] }
 0x5f5   : > { %3631 = vmatpush1.bf16.msra.mxu0 %v4328_v25  ;;  %v4258_v25 = vcombine.low %v1909_v13, %v1913_v31  ;;  %v1957_v5 = vld [vmem:[#allocation12 + $0x318] sm:$0xff] }
 0x5f6   : > { %3672 = vmatpush1.bf16.msra.mxu1 %v4456_v26  ;;  %3682 = vmatprep.subr.bf16.mxu0 %v4211_v27  ;;  %v4386_v26 = vcombine.low %v2037_v36, %v2041_v14  ;;  %v4267_v27 = vcombine.high %v1917_v21, %v1921_v22  ;;  %v1961_v6 = vld [vmem:[#allocation12 + $0x338] sm:$0xff] }
 0x5f7   : > { %3723 = vmatprep.subr.bf16.mxu1 %v4339_v28  ;;  %v4395_v28 = vcombine.high %v2045_v23, %v2049_v24  ;;  %v2085_v7 = vld [vmem:[#allocation12 + $0x718] sm:$0xff] }
 0x5f8   : > { %3633 = vmatmul.mubr.bf16.vlgmr.msra.gmra.mrb[16].mxu0 %v5427_v57  ;;  %v2089_v8 = vld [vmem:[#allocation12 + $0x738] sm:$0xff] }
 0x5f9   : > { %3674 = vmatmul.mubr.bf16.vlgmr.msra.gmra.mrb[16].mxu1 %v5429_v58  ;;  %3683 = vmatpush1.bf16.msra.mxu0 %v4210_v34  ;;  %v2053_v34 = vld [vmem:[#allocation12 + $0x618] sm:$0xff] }
 0x5fa   : > { %3714 = vmatprep.mubr.bf16.mxu0 %v5423_v55  ;;  %3724 = vmatpush1.bf16.msra.mxu1 %v4338_v40  ;;  %v4363_v55 = vcombine.high %v2013_v53, %v2017_v54  ;;  %v4394_v40 = vcombine.low %v2045_v23, %v2049_v24  ;;  %v4403_v43 = vcombine.high %v2053_v34, %v2057_v37  ;;  %v2069_v53 = vld [vmem:[#allocation12 + $0x698] sm:$0xff] }
 0x5fb   : > { %3755 = vmatprep.mubr.bf16.mxu1 %v5425_v56  ;;  %3684 = vmatprep.subr.bf16.mxu0 %v4219_v42  ;;  %v4234_v56 = vcombine.low %v1885_v51, %v1889_v52  ;;  %v4275_v42 = vcombine.high %v1925_v29, %v1929_v30  ;;  %v1941_v51 = vld [vmem:[#allocation12 + $0x298] sm:$0xff] }
 0x5fc   : > { %3725 = vmatprep.subr.bf16.mxu1 %v4347_v45  ;;  %v1937_v45 = vld [vmem:[#allocation12 + $0x278] sm:$0xff] }
 0x5fd   : > { %3685 = vmatpush1.bf16.msra.mxu0 %v4218_v47  ;;  %v4274_v47 = vcombine.low %v1925_v29, %v1929_v30  ;;  %v1945_v52 = vld [vmem:[#allocation12 + $0x2b8] sm:$0xff] }
 0x5fe   : > { %3726 = vmatpush1.bf16.msra.mxu1 %v4346_v48  ;;  %3686 = vmatprep.subr.bf16.mxu0 %v4227_v49  ;;  %v4402_v48 = vcombine.low %v2053_v34, %v2057_v37  ;;  %v4283_v49 = vcombine.high %v1933_v44, %v1937_v45  ;;  %v2073_v54 = vld [vmem:[#allocation12 + $0x6b8] sm:$0xff] }
 0x5ff   : > { %3727 = vmatprep.subr.bf16.mxu1 %v4355_v50  ;;  %v4411_v50 = vcombine.high %v2061_v41, %v2065_v46  ;;  %v1965_v13 = vld [vmem:[#allocation12 + $0x358] sm:$0xff] }
 0x600   : > { %v1969_v31 = vld [vmem:[#allocation12 + $0x378] sm:$0xff] }
 0x601   : > { %3687 = vmatpush1.bf16.msra.mxu0 %v4226_v59  ;;  %v4282_v59 = vcombine.low %v1933_v44, %v1937_v45  ;;  %v2093_v36 = vld [vmem:[#allocation12 + $0x758] sm:$0xff] }
 0x602   : > { %3728 = vmatpush1.bf16.msra.mxu1 %v4354_v60  ;;  %3688 = vmatprep.subr.bf16.mxu0 %v4235_v61  ;;  %v4410_v60 = vcombine.low %v2061_v41, %v2065_v46  ;;  %v4291_v61 = vcombine.high %v1941_v51, %v1945_v52  ;;  %v2097_v14 = vld [vmem:[#allocation12 + $0x778] sm:$0xff]  ;;  %v2114_v41 = vld [vmem:[%s5595_s11] sm:$0xff] }
 0x603   : > { %3729 = vmatprep.subr.bf16.mxu1 %v4363_v55  ;;  %v4419_v55 = vcombine.high %v2069_v53, %v2073_v54  ;;  %v1973_v21 = vld [vmem:[#allocation12 + $0x398] sm:$0xff]  ;;  %v2119_v46 = vrot.slane %v2114_v41, %v5321_v33  ;;  %v2127_v33 = vrot.slane %v2114_v41, %v1836_v18  ;;  %v2134_v18 = vsub.s32 4, %v5318_v32 }
 0x604   : > { %v1977_v22 = vld [vmem:[#allocation12 + $0x3b8] sm:$0xff] }
 0x605   : > { %3689 = vmatpush1.bf16.msra.mxu0 %v4234_v56  ;;  %v4290_v56 = vcombine.low %v1941_v51, %v1945_v52  ;;  %v2101_v23 = vld [vmem:[#allocation12 + $0x798] sm:$0xff] }
 0x606   : > { %3730 = vmatpush1.bf16.msra.mxu1 %v4362_v1  ;;  %3690 = vmatprep.subr.bf16.mxu0 %v4243_v2  ;;  %v4418_v1 = vcombine.low %v2069_v53, %v2073_v54  ;;  %v4299_v2 = vcombine.high %v1949_v62, %v1953_v39  ;;  %v2105_v24 = vld [vmem:[#allocation12 + $0x7b8] sm:$0xff] }
 0x607   : > { %3731 = vmatprep.subr.bf16.mxu1 %v4371_v3  ;;  %v4427_v3 = vcombine.high %v2077_v63, %v2081_v0  ;;  %v1981_v29 = vld [vmem:[#allocation12 + $0x3d8] sm:$0xff] }
 0x608   : > { %v1985_v30 = vld [vmem:[#allocation12 + $0x3f8] sm:$0xff] }
 0x609   : > { %3691 = vmatpush1.bf16.msra.mxu0 %v4242_v11  ;;  %v4298_v11 = vcombine.low %v1949_v62, %v1953_v39  ;;  %v2109_v34 = vld [vmem:[#allocation12 + $0x7d8] sm:$0xff]  ;;  %v4330_v44 = vcombine.low %v1981_v29, %v1985_v30 }
 0x60a   : > { %3732 = vmatpush1.bf16.msra.mxu1 %v4370_v12  ;;  %3692 = vmatprep.subr.bf16.mxu0 %v4251_v9  ;;  %v4426_v12 = vcombine.low %v2077_v63, %v2081_v0  ;;  %v4307_v9 = vcombine.high %v1957_v5, %v1961_v6  ;;  %v2113_v37 = vld [vmem:[#allocation12 + $0x7f8] sm:$0xff] }
 0x60b   : > { %3733 = vmatprep.subr.bf16.mxu1 %v4379_v10  ;;  %v4435_v10 = vcombine.high %v2085_v7, %v2089_v8  ;;  %v4458_v45 = vcombine.low %v2109_v34, %v2113_v37 }
 0x60d   : > { %3693 = vmatpush1.bf16.msra.mxu0 %v4250_v15  ;;  %v4306_v15 = vcombine.low %v1957_v5, %v1961_v6 }
 0x60e   : > { %3734 = vmatpush1.bf16.msra.mxu1 %v4378_v16  ;;  %3694 = vmatprep.subr.bf16.mxu0 %v4259_v17  ;;  %v4434_v16 = vcombine.low %v2085_v7, %v2089_v8  ;;  %v4315_v17 = vcombine.high %v1965_v13, %v1969_v31  ;;  %v2138_v8 = vsub.s32 5, %v5318_v32 }
 0x60f   : > { %3735 = vmatprep.subr.bf16.mxu1 %v4387_v19  ;;  %v4443_v19 = vcombine.high %v2093_v36, %v2097_v14 }
 0x611   : > { %3695 = vmatpush1.bf16.msra.mxu0 %v4258_v25  ;;  %v4314_v25 = vcombine.low %v1965_v13, %v1969_v31 }
 0x612   : > { %3736 = vmatpush1.bf16.msra.mxu1 %v4386_v26  ;;  %3696 = vmatprep.subr.bf16.mxu0 %v4267_v27  ;;  %v4442_v26 = vcombine.low %v2093_v36, %v2097_v14  ;;  %v4323_v27 = vcombine.high %v1973_v21, %v1977_v22 }
 0x613   : > { %3737 = vmatprep.subr.bf16.mxu1 %v4395_v28  ;;  %v4451_v28 = vcombine.high %v2101_v23, %v2105_v24 }
 0x615   : > { %3697 = vmatpush1.bf16.msra.mxu0 %v4266_v38  ;;  %v4322_v38 = vcombine.low %v1973_v21, %v1977_v22  ;;  %v2142_v22 = vsub.s32 6, %v5318_v32 }
 0x616   : > { %3738 = vmatpush1.bf16.msra.mxu1 %v4394_v40  ;;  %3698 = vmatprep.subr.bf16.mxu0 %v4275_v42  ;;  %v4450_v40 = vcombine.low %v2101_v23, %v2105_v24  ;;  %v4331_v42 = vcombine.high %v1981_v29, %v1985_v30  ;;  %v2146_v23 = vsub.s32 7, %v5318_v32 }
 0x617   : > { %3739 = vmatprep.subr.bf16.mxu1 %v4403_v43  ;;  %v4459_v43 = vcombine.high %v2109_v34, %v2113_v37  ;;  %v2143_v24 = vrot.slane %v2114_v41, %v2142_v22 }
 0x619   : > { %3699 = vmatpush1.bf16.msra.mxu0 %v4274_v47  ;;  %v2123_v47 = vrot.slane %v2114_v41, %v5327_v35  ;;  %v2131_v35 = vrot.slane %v2114_v41, %v1840_v20  ;;  %v2135_v20 = vrot.slane %v2114_v41, %v2134_v18 }
 0x61a   : > { %3740 = vmatpush1.bf16.msra.mxu1 %v4402_v48  ;;  %3700 = vmatprep.subr.bf16.mxu0 %v4283_v49 }
 0x61b   : > { %3741 = vmatprep.subr.bf16.mxu1 %v4411_v50 }
 0x61d   : > { %3701 = vmatpush1.bf16.msra.mxu0 %v4282_v59 }
 0x61e   : > { %3742 = vmatpush1.bf16.msra.mxu1 %v4410_v60  ;;  %3702 = vmatprep.subr.bf16.mxu0 %v4291_v61 }
 0x61f   : > { %3743 = vmatprep.subr.bf16.mxu1 %v4419_v55 }
 0x621   : > { %3703 = vmatpush1.bf16.msra.mxu0 %v4290_v56 }
 0x622   : > { %3744 = vmatpush1.bf16.msra.mxu1 %v4418_v1  ;;  %3704 = vmatprep.subr.bf16.mxu0 %v4299_v2 }
 0x623   : > { %3745 = vmatprep.subr.bf16.mxu1 %v4427_v3 }
 0x625   : > { %3705 = vmatpush1.bf16.msra.mxu0 %v4298_v11  ;;  %v2139_v11 = vrot.slane %v2114_v41, %v2138_v8 }
 0x626   : > { %3746 = vmatpush1.bf16.msra.mxu1 %v4426_v12  ;;  %3706 = vmatprep.subr.bf16.mxu0 %v4307_v9 }
 0x627   : > { %3747 = vmatprep.subr.bf16.mxu1 %v4435_v10 }
 0x629   : > { %3707 = vmatpush1.bf16.msra.mxu0 %v4306_v15 }
 0x62a   : > { %3748 = vmatpush1.bf16.msra.mxu1 %v4434_v16  ;;  %3708 = vmatprep.subr.bf16.mxu0 %v4315_v17 }
 0x62b   : > { %3749 = vmatprep.subr.bf16.mxu1 %v4443_v19 }
 0x62d   : > { %3709 = vmatpush1.bf16.msra.mxu0 %v4314_v25  ;;  %v2147_v25 = vrot.slane %v2114_v41, %v2146_v23 }
 0x62e   : > { %3750 = vmatpush1.bf16.msra.mxu1 %v4442_v26  ;;  %3710 = vmatprep.subr.bf16.mxu0 %v4323_v27 }
 0x62f   : > { %3751 = vmatprep.subr.bf16.mxu1 %v4451_v28 }
 0x631   : > { %3711 = vmatpush1.bf16.msra.mxu0 %v4322_v38 }
 0x632   : > { %3752 = vmatpush1.bf16.msra.mxu1 %v4450_v40  ;;  %3712 = vmatprep.subr.bf16.mxu0 %v4331_v42 }
 0x633   : > { %3753 = vmatprep.subr.bf16.mxu1 %v4459_v43 }
 0x635   : > { %3713 = vmatpush1.bf16.msra.mxu0 %v4330_v44 }
 0x636   : > { %3754 = vmatpush1.bf16.msra.mxu1 %v4458_v45 }
 0x638   : > { %3715 = vmatmul.mubr.bf16.vlgmr.msra.gmra.mrb[20].mxu0 %v5427_v57 }
 0x639   : > { %3756 = vmatmul.mubr.bf16.vlgmr.msra.gmra.mrb[20].mxu1 %v5429_v58 }
 0x64b   : > { %v3470_v48 = vpop.f32.mrb[8].mxu0  ;;  %v3511_v49 = vpop.f32.mrb[8].mxu1 }
 0x64c   : > { %v3471_v50 = vadd.f32 %v3470_v48, %v2119_v46  ;;  %v3472_v51 = vpop.f32.mrb[9].mxu0  ;;  %v3513_v52 = vpop.f32.mrb[9].mxu1 }
 0x64d   : > { %v3473_v53 = vadd.f32 %v3472_v51, %v2123_v47  ;;  %v3474_v54 = vpop.f32.mrb[10].mxu0  ;;  %v3515_v59 = vpop.f32.mrb[10].mxu1 }
 0x64e   : > { %v5452_v60 = vadd.f32 %v3511_v49, %v3471_v50  ;;  %v3475_v57 = vpop.f32.mrb[11].mxu0  ;;  %v3516_v58 = vpop.f32.mrb[11].mxu1 }
 0x64f   : > { %v5454_v61 = vadd.f32 %v3513_v52, %v3473_v53 }
 0x68b   : > { %v3552_v55 = vpop.f32.mrb[12].mxu0  ;;  %v3593_v62 = vpop.f32.mrb[12].mxu1 }
 0x68c   : > { %v3553_v39 = vadd.f32 %v3552_v55, %v2127_v33  ;;  %v3554_v63 = vpop.f32.mrb[13].mxu0  ;;  %v3595_v0 = vpop.f32.mrb[13].mxu1 }
 0x68d   : > { %v3555_v56 = vadd.f32 %v3554_v63, %v2131_v35  ;;  %v3556_v1 = vpop.f32.mrb[14].mxu0  ;;  %v3597_v2 = vpop.f32.mrb[14].mxu1 }
 0x68e   : > { %v5460_v3 = vadd.f32 %v3593_v62, %v3553_v39  ;;  %v3557_v5 = vpop.f32.mrb[15].mxu0  ;;  %v3598_v6 = vpop.f32.mrb[15].mxu1 }
 0x68f   : > { %v5462_v7 = vadd.f32 %v3595_v0, %v3555_v56 }
 0x6cb   : > { %v3634_v12 = vpop.f32.mrb[16].mxu0 }
 0x6cc   : > { %v3635_v9 = vadd.f32 %v3634_v12, %v2135_v20  ;;  %v3675_v10 = vpop.f32.mrb[16].mxu1  ;;  %v3636_v13 = vpop.f32.mrb[17].mxu0 }
 0x6cd   : > { %v3637_v31 = vadd.f32 %v3636_v13, %v2139_v11  ;;  %v3677_v36 = vpop.f32.mrb[17].mxu1  ;;  %v3638_v14 = vpop.f32.mrb[18].mxu0 }
 0x6ce   : > { %v5467_v15 = vadd.f32 %v3675_v10, %v3635_v9  ;;  %v3679_v16 = vpop.f32.mrb[18].mxu1  ;;  %v3639_v17 = vpop.f32.mrb[19].mxu0 }
 0x6cf   : > { %v5469_v19 = vadd.f32 %v3677_v36, %v3637_v31  ;;  %v3680_v21 = vpop.f32.mrb[19].mxu1 }
 0x709   : > { %3960 = sbr.rel (%p3959_p9) target bundleno = 1967 (0x7af), region = 148 }
 0x70b   : > { %v3716_v26 = vpop.f32.mrb[20].mxu0 }
 0x70c   : > { %v3717_v27 = vadd.f32 %v3716_v26, %v2143_v24  ;;  %v3757_v28 = vpop.f32.mrb[20].mxu1  ;;  %v3718_v29 = vpop.f32.mrb[21].mxu0 }
 0x70d   : > { %v3719_v30 = vadd.f32 %v3718_v29, %v2147_v25  ;;  %v3759_v34 = vpop.f32.mrb[21].mxu1  ;;  %v3720_v37 = vpop.f32.mrb[22].mxu0 }
 0x70e   : > { %v5473_v38 = vadd.f32 %v3757_v28, %v3717_v27  ;;  %v3761_v40 = vpop.f32.mrb[22].mxu1  ;;  %v3721_v42 = vpop.f32.mrb[23].mxu0 }
 0x70f   : > { %v5475_v43 = vadd.f32 %v3759_v34, %v3719_v30  ;;  %v3762_v44 = vpop.f32.mrb[23].mxu1 }
 0x710 LB: >> { %v5064_v45 = vmov 0   ;;  %v3771_v41 = vstv %s5041_s17  ;;  %v5065_v46 = vmov -1e+30   ;;  %v5066_v48 = vmov 1966171168   ;;  %s3835_s7 = sshra.s32 %s5041_s17, 3  ;;  %s5041_s17 = sphi %s5289_s17, %s3768_s17  }
 0x711   : >> { %4818 = vset.pattern.permute.xlu0 %v5064_v45  ;;  %vm3772_vm6 = vcmp.eq.s32.totalorder %v5305_v4, %v3771_v41  ;;  %v3859_v49 = vunpack.c.l.s4 %v5066_v48  ;;  %s3838_s18 = sand.u32 7, %s5041_s17  ;;  %s4467_s22 = sshll.u32 %s3835_s7, 6 }
 0x712   : >> { %v3773_v47 = vsel %vm3772_vm6, 0.0, %v5065_v46  ;;  %s3841_s16 = sadd.s32 %s4467_s22, %s3838_s18  ;;  %s3768_s17 = sadd.s32 1, %s5041_s17  }
 0x713   : >> { %3776 = vperm.xlu0 %4818, %v3773_v47   ;;  %v3860_v50 = vunpack.c.0.s8 %v3859_v49  ;;  %s3842_s23 = scalar_lea.vmem [#allocation14], %s3841_s16  ;;  %p3767_p11 = scmp.ge.s32.totalorder %s3768_s17, %s3764_s25 }
 0x715   : >> { %v5489_v51 = vsub.s32 %v3860_v50, %v5318_v32 }
 0x792   : >> { %v3777_v52 = vpop.permute.xlu0 %3776 }
 0x793   : >> { %v3779_v53 = vadd.f32 %v3777_v52, %v5452_v60  ;;  %v3780_v54 = vadd.f32 %v3777_v52, %v5454_v61  ;;  %v3781_v59 = vadd.f32 %v3777_v52, %v5460_v3  ;;  %v3782_v57 = vadd.f32 %v3777_v52, %v5462_v7 }
 0x794   : >> { %v3783_v58 = vadd.f32 %v3777_v52, %v5467_v15  ;;  %v3784_v33 = vadd.f32 %v3777_v52, %v5469_v19  ;;  %v3785_v35 = vadd.f32 %v3777_v52, %v5473_v38  ;;  %v3786_v55 = vadd.f32 %v3777_v52, %v5475_v43 }
 0x795   : >> { %v3787_v62 = vrot.slane %v3779_v53, 4  ;;  %v3793_v39 = vrot.slane %v3780_v54, 4  ;;  %v3799_v63 = vrot.slane %v3781_v59, 4  ;;  %v3805_v0 = vrot.slane %v3782_v57, 4 }
 0x796   : >> { %v3811_v56 = vrot.slane %v3783_v58, 4  ;;  %v3817_v1 = vrot.slane %v3784_v33, 4  ;;  %v3823_v2 = vrot.slane %v3785_v35, 4  ;;  %v3829_v5 = vrot.slane %v3786_v55, 4 }
 0x797   : >> { %v3788_v6 = vmax.f32 %v3779_v53, %v3787_v62  ;;  %v3794_v18 = vmax.f32 %v3780_v54, %v3793_v39  ;;  %v3800_v8 = vmax.f32 %v3781_v59, %v3799_v63  ;;  %v3806_v20 = vmax.f32 %v3782_v57, %v3805_v0  ;;  %v3843_v0 = vld [vmem:[%s3842_s23] ss:$8 sm:$0xf] }
 0x798   : >> { %v3812_v11 = vmax.f32 %v3783_v58, %v3811_v56  ;;  %v3818_v12 = vmax.f32 %v3784_v33, %v3817_v1  ;;  %v3824_v9 = vmax.f32 %v3785_v35, %v3823_v2  ;;  %v3830_v10 = vmax.f32 %v3786_v55, %v3829_v5  ;;  %v3844_v56 = vld [vmem:[%s3842_s23] ss:$8 sm:$0xf0] }
 0x799   : >> { %v3789_v13 = vrot.slane %v3788_v6, 2  ;;  %v3795_v31 = vrot.slane %v3794_v18, 2  ;;  %v3801_v36 = vrot.slane %v3800_v8, 2  ;;  %v3807_v14 = vrot.slane %v3806_v20, 2 }
 0x79a   : >> { %v3813_v16 = vrot.slane %v3812_v11, 2  ;;  %v3819_v17 = vrot.slane %v3818_v12, 2  ;;  %v3825_v21 = vrot.slane %v3824_v9, 2  ;;  %v3831_v22 = vrot.slane %v3830_v10, 2 }
 0x79b   : >> { %v3790_v23 = vmax.f32 %v3788_v6, %v3789_v13  ;;  %v3796_v24 = vmax.f32 %v3794_v18, %v3795_v31  ;;  %v3802_v25 = vmax.f32 %v3800_v8, %v3801_v36  ;;  %v3808_v26 = vmax.f32 %v3806_v20, %v3807_v14 }
 0x79c   : >> { %v3814_v27 = vmax.f32 %v3812_v11, %v3813_v16  ;;  %v3820_v28 = vmax.f32 %v3818_v12, %v3819_v17  ;;  %v3826_v29 = vmax.f32 %v3824_v9, %v3825_v21  ;;  %v3832_v30 = vmax.f32 %v3830_v10, %v3831_v22 }
 0x79d   : >> { %v3791_v34 = vrot.slane %v3790_v23, 1  ;;  %v3797_v37 = vrot.slane %v3796_v24, 1  ;;  %v3803_v40 = vrot.slane %v3802_v25, 1  ;;  %v3809_v42 = vrot.slane %v3808_v26, 1 }
 0x79e   : >> { %v3815_v44 = vrot.slane %v3814_v27, 1  ;;  %v3821_v45 = vrot.slane %v3820_v28, 1  ;;  %v3827_v41 = vrot.slane %v3826_v29, 1  ;;  %v3833_v46 = vrot.slane %v3832_v30, 1 }
 0x79f   : >> { %v3792_v47 = vmax.f32 %v3790_v23, %v3791_v34  ;;  %v3798_v48 = vmax.f32 %v3796_v24, %v3797_v37  ;;  %v3804_v49 = vmax.f32 %v3802_v25, %v3803_v40  ;;  %v3810_v50 = vmax.f32 %v3808_v26, %v3809_v42 }
 0x7a0   : >> { %v3816_v52 = vmax.f32 %v3814_v27, %v3815_v44  ;;  %v3822_v53 = vmax.f32 %v3820_v28, %v3821_v45  ;;  %v3828_v54 = vmax.f32 %v3826_v29, %v3827_v41  ;;  %v3834_v59 = vmax.f32 %v3832_v30, %v3833_v46 }
 0x7a1   : >> { %v3854_v57 = vcombine.low %v3792_v47, %v3798_v48  ;;  %v3855_v58 = vcombine.low %v3804_v49, %v3810_v50  ;;  %v3845_v6 = vor.u32 %v3844_v56, %v3843_v0 }
 0x7a2   : >> { %v3856_v33 = vcombine.low %v3816_v52, %v3822_v53  ;;  %v3857_v35 = vcombine.low %v3828_v54, %v3834_v59 }
 0x7a3   : >> { %v3864_v55 = vrot.slane %v3854_v57, %v5489_v51  ;;  %v3871_v62 = vrot.slane %v3855_v58, %v5489_v51 }
 0x7a4   : >> { %v3878_v39 = vrot.slane %v3856_v33, %v5489_v51  ;;  %v3885_v63 = vrot.slane %v3857_v35, %v5489_v51 }
 0x7a5   : >> { %v3886_v1 = vcombine.low %v3864_v55, %v3871_v62 }
 0x7a6   : >> { %v3887_v2 = vcombine.low %v3878_v39, %v3885_v63 }
 0x7a7   : >> { %v3894_v5 = vrot.slane %v3886_v1, %v5489_v51 }
 0x7a8   : >> { %v3901_v18 = vrot.slane %v3887_v2, %v5489_v51  ;;  %3770 = sbr.rel (!%p3767_p11) target bundleno = 1808 (0x710), region = 154 }
 0x7aa   : >> { %v3902_v8 = vcombine.low %v3894_v5, %v3901_v18 }
 0x7ac   : >> { %v3904_v20 = vmax.f32 %v3845_v6, %v3902_v8 }
 0x7ae   : >> { %3905 = vst [vmem:[%s3842_s23] ss:$8 sm:$0xf] %v3904_v20  ;;  %3906 = vst [vmem:[%s3842_s23] ss:$8 sm:$0xf0] %v3904_v20 }
 0x7af PF: > { %s5596_s19 = sld [smem:[#allocation20_spill]]  ;;  %s5067_s15 = smov [#allocation14]  }
 0x7b0   : > { %s3914_s14 = sshll.u32 %s5067_s15, 4  ;;  %s3915_s14 = int_to_ptr.vmem [resolvable:$true] %s3914_s14 }
 0x7b1   : > { %s4943_s13 = scalar_lea.vmem %s3915_s14, 1024  ;;  %p4950_p12 = scmp.lt.s32.totalorder %s3915_s14, %s3915_s14 }
 0x7b2   : > { %p4944_p7 = scmp.ne.s32.totalorder %s3915_s14, %s4943_s13  ;;  %p4951_p0 = scmp.lt.s32.totalorder %s4943_s13, %s4943_s13 }
 0x7b4   : > { %p4952_p1 = por %p4951_p0, %p4950_p12 }
 0x7b5   : > { %s5597_s12 = sadd.s32 4294967295, %s5596_s19  }
 0x7b6   : > { %p5514_p8 = scmp.eq.s32.totalorder %s5597_s12, 3 }
 0x7b8   : > { %p4945_p13 = pnand %p4944_p7, %p5514_p8 }
 0x7ba   : > { %p4946_p10 = pneg %p4945_p13 }
 0x7bc   : > { %p4953_p2 = pnand %p4952_p1, %p4946_p10 }
 0x7be   : > { %4956 = shalt.err (!%p4953_p2)
}
 0x7bf   : > { %s5599_s26 = sld [smem:[#allocation25_spill]] }
 0x7c5   : > { %s5600_s21 = smov %s5599_s26  ;;  %s4957_s0 = scalar_lea.hbm %s5599_s26, 1024 }
 0x7c6   : > { %p4958_p3 = scmp.ne.s32.totalorder %s5600_s21, %s4957_s0  ;;  %p4963_p6 = scmp.lt.u32.totalorder %s4957_s0, %s5600_s21 }
 0x7c8   : > { %p4959_p4 = pnand %p4958_p3, %p5514_p8 }
 0x7ca   : > { %p4960_p5 = pneg %p4959_p4 }
 0x7cc   : > { %p4965_p9 = pnand %p4963_p6, %p4960_p5 }
 0x7ce   : > { %4968 = shalt.err (!%p4965_p9)
}
 0x7cf   : > { %4493 = dma.vmem_to_hbm [thread:$0]  (%p5514_p8), %s3915_s14, 1024, %s5600_s21, [#allocation8]  }
 0x7d0   : > { %5012 = dma.done.wait (%p5514_p8), [#allocation8], 1024  }
 0x7d1   : > { %5014 = vsyncadd (%p5514_p8), [#allocation8], 4294966272 }
 0x7d2 PF: > { %s5601_s22 = sld [smem:[#allocation20_spill]]  ;;  %s5602_s16 = sld [smem:[#allocation21_spill]] }
 0x7d3   : > { %s5603_s26 = smov %s5025_s27  ;;  %s5604_s0 = smov %s5029_s28 }
 0x7d4   : > { %s5606_s28 = smov %s5612_s24 }
 0x7d8   : > { %s32_s29 = sadd.s32 1, %s5601_s22   ;;  %s5605_s27 = smov %s5602_s16 }
 0x7d9   : > { %p29_p11 = scmp.ge.s32.totalorder %s32_s29, 6  }
 0x7db   :  { %31 = sbr.rel (!%p29_p11) target bundleno = 23 (0x17), region = 165 }
 0x7e2   :  { %3927 = vsyncpa [#allocation7], 1 }
 0x7e3   :  { %3929 = vsyncpa [#allocation7 + $0x1], 1 }
 0x7e4   :  { %3930 = vsyncpa [#allocation10], 1 }
 0x7e5   :  { %3931 = vsyncpa [#allocation13], 1 }
 0x7e6   :  { %3932 = vsyncpa [#allocation8], 1 }
 0x7e7   :  { %3934 = vsyncpa [#allocation8 + $0x1], 1 }

</bundles_post_ra>
